<compile_context>
chip_gen: v7x
topology: tpu7x:2x2x1
jax: 0.10.0
libtpu: 0.0.40
codegen_flags: <defaults>
</compile_context>

<pallas_src>
import jax
import jax.numpy as jnp
from jax.experimental import pallas as pl
from jax.experimental.pallas import tpu as pltpu


def _round_up(x, m):
    return (x + m - 1) // m * m


def build_fused_forward(cin, hid, H, W, n_cls):
    """Returns (jitted forward, param-packer) for the fused CNN forward."""
    KH = KW = 3
    PH, PW = H + 2, W + 2              # spatially padded ("same" conv) grid
    NPIX = PH * PW                     # 324 for 16x16
    NP = _round_up(NPIX, 128)          # lane-dense padded-grid width (384)
    NCP = 128                          # n_cls padded to one full lane tile
    CS = _round_up(max(cin, hid), 8)   # sublane stride of one tap group
    BIAS_ROW = KH * KW * CS            # constant-ones rows (conv-bias fold)
    KS = BIAS_ROW + 8                  # tap-stage height == K of conv matmuls
    TAP_OFFS = [(i - 1) * PW + (j - 1) for i in range(KH) for j in range(KW)]

    # ------------------------------ kernel ---------------------------------
    def kernel(x_ref, w1_ref, w2_ref, wfc_ref, bfc_ref, mask_ref,
               feat1_ref, feat2_ref, preds_ref, stage_ref, fcx_ref):
        b_blk = preds_ref.shape[0]
        LN = b_blk * NP                                   # lanes per grid step

        # One-time init (first grid step only): conv1 writes only `cin` of the
        # CS rows in each tap group, so the rest must start at 0 (afterwards
        # they hold stale-but-finite conv2 taps hit by zero weight columns);
        # the trailing 8 rows are the constant-ones used by the folded bias.
        @pl.when(pl.program_id(0) == 0)
        def _init():
            stage_ref[pl.ds(0, BIAS_ROW), :] = jnp.zeros((BIAS_ROW, LN), stage_ref.dtype)
            stage_ref[pl.ds(BIAS_ROW, 8), :] = jnp.ones((8, LN), stage_ref.dtype)

        # interior mask (zero on the padding ring and the lane tail), tiled
        # across the batch lanes; kept in f32 (v5e VPU has no bf16).
        mask = jnp.tile(mask_ref[...], (1, b_blk))        # (1, LN)

        def stage_taps(src_f32, rows):
            # 3x3 "same" conv as ONE matmul: the 9 shifted copies of the
            # flattened padded grid are lane ROTATIONS (XLU) of `src`; the
            # circular wrap / cross-element lanes only land on ring/tail
            # output pixels, which are masked or cropped later.
            for t, d in enumerate(TAP_OFFS):
                tap = pltpu.roll(src_f32, shift=(-d) % LN, axis=1) if d else src_f32
                stage_ref[pl.ds(t * CS, rows), :] = tap.astype(stage_ref.dtype)

        # ---- conv1 (+bias folded): one (hid, KS) @ (KS, LN) bf16 MXU matmul
        stage_taps(x_ref[...], cin)
        z1 = jnp.dot(w1_ref[...], stage_ref[...],
                     preferred_element_type=jnp.float32)   # (hid, LN) f32
        feat1_ref[...] = z1                                 # hooked (pre-ReLU)
        a1 = jnp.maximum(z1, 0.0) * mask                    # zero ring => "same" padding for conv2

        # ---- conv2 (+bias folded)
        stage_taps(a1, hid)
        z2 = jnp.dot(w2_ref[...], stage_ref[...],
                     preferred_element_type=jnp.float32)    # (hid, LN) f32
        feat2_ref[...] = z2                                 # hooked (pre-ReLU)
        a2 = jnp.maximum(z2, 0.0)                           # wfc rows are zero on ring/tail pixels

        # ---- fc: gather each element's activations into one lane-dense row
        # (lane order c*NP + p, matching the wfc packing), then a single
        # (b_blk, hid*NP) @ (hid*NP, NCP) matmul with K = 3072.
        for b in range(b_blk):
            for c in range(hid):
                fcx_ref[pl.ds(b, 1), pl.ds(c * NP, NP)] = a2[c:c + 1, b * NP:(b + 1) * NP]
        preds_ref[...] = jnp.dot(fcx_ref[...].astype(jnp.bfloat16), wfc_ref[...],
                                 preferred_element_type=jnp.float32) + bfc_ref[...]

    # --------------------------- batch blocking -----------------------------
    def _pick_b_blk(B):
        # v7x has 2 TensorCores: keep >=2 grid steps when the batch splits into
        # (8,128)-tileable halves.  On 1-TC v5e/v6e a single big step minimizes
        # the ~0.35us/step overhead.  VMEM/elem in flight is ~130 KB (+ ~1.6 MB
        # resident bf16 fc weights), so cap b_blk well under the 32 MiB scoped
        # default (and v7x's 64 MiB physical).
        if B >= 16 and B % 16 == 0:
            b = B // 2
            while b > 64 and b % 16 == 0:
                b //= 2
            return b
        return B

    # ------------------------------ wrapper ---------------------------------
    def forward(x_nchw, pk):
        B = x_nchw.shape[0]
        b_blk = _pick_b_blk(B)
        n_steps = B // b_blk
        LN = b_blk * NP

        # Input prep (tiny, XLA fuses it): zero-pad the ring ("same" conv) and
        # the lane tail, then lay out channel-major with the batch concatenated
        # along lanes: (cin, B*NP).  No extended/halo buffer is needed because
        # the in-kernel taps are lane rotations.
        xp = jnp.pad(x_nchw, ((0, 0), (0, 0), (1, 1), (1, 1))).reshape(B, cin, NPIX)
        xp = jnp.pad(xp, ((0, 0), (0, 0), (0, NP - NPIX)))
        x_lanes = jnp.transpose(xp, (1, 0, 2)).reshape(cin, B * NP)

        feat1, feat2, preds = pl.pallas_call(
            kernel,
            out_shape=(
                jax.ShapeDtypeStruct((hid, B * NP), jnp.float32),
                jax.ShapeDtypeStruct((hid, B * NP), jnp.float32),
                jax.ShapeDtypeStruct((B, NCP), jnp.float32),
            ),
            grid=(n_steps,),
            in_specs=[
                pl.BlockSpec((cin, LN), lambda s: (0, s)),        # x (batch stacked on lanes)
                # grid-invariant operands below (constant index_map); ideally
                # single-buffered via pipeline_mode=pl.Buffered(1), left at the
                # default for lowering portability (total VMEM ~<11 MB even at
                # the b_blk cap, far under the 32 MiB scoped default).
                pl.BlockSpec((hid, KS), lambda s: (0, 0)),        # fused conv1 weights (+bias col)
                pl.BlockSpec((hid, KS), lambda s: (0, 0)),        # fused conv2 weights (+bias col)
                pl.BlockSpec((hid * NP, NCP), lambda s: (0, 0)),  # fc weights (padded-grid scatter)
                pl.BlockSpec((1, NCP), lambda s: (0, 0)),         # fc bias
                pl.BlockSpec((1, NP), lambda s: (0, 0)),          # interior mask
            ],
            out_specs=(
                pl.BlockSpec((hid, LN), lambda s: (0, s)),        # conv1 features (lane-dense)
                pl.BlockSpec((hid, LN), lambda s: (0, s)),        # conv2 features (lane-dense)
                pl.BlockSpec((b_blk, NCP), lambda s: (s, 0)),     # logits (128 lanes)
            ),
            scratch_shapes=[
                pltpu.VMEM((KS, LN), jnp.bfloat16),               # shared conv tap stage
                pltpu.VMEM((b_blk, hid * NP), jnp.float32),       # fc activation stage
            ],
            compiler_params=pltpu.CompilerParams(
                dimension_semantics=("parallel",)),
        )(x_lanes, pk["w1"], pk["w2"], pk["wfc"], pk["bfc"], pk["mask"])

        # unpack to PyTorch layouts: (hid, B*NP) -> (B, hid, H, W); (B,NCP)->(B,n_cls)
        def unpack(f):
            f = f.reshape(hid, B, NP)[:, :, :NPIX].reshape(hid, B, PH, PW)
            return jnp.transpose(f[:, :, 1:1 + H, 1:1 + W], (1, 0, 2, 3))

        return unpack(feat1), unpack(feat2), preds[:, :n_cls]

    # ------------------------- one-time weight prep --------------------------
    def pack_params(p):
        def pack_conv(w, b):
            # fused conv weight (hid, KS): tap (i,j) channel c sits at column
            # (i*KW+j)*CS + c; the bias is folded at column BIAS_ROW (the stage
            # holds constant ones there); all other columns are zero.
            c_in = w.shape[1]
            wf = jnp.zeros((hid, KS), jnp.float32)
            for i in range(KH):
                for j in range(KW):
                    t = i * KW + j
                    wf = wf.at[:, t * CS:t * CS + c_in].set(w[:, :, i, j])
            wf = wf.at[:, BIAS_ROW].set(b)
            return wf.astype(jnp.bfloat16)

        # fc: PyTorch flatten order is (C, H, W); scatter onto the padded grid
        # (zero ring / zero lane-tail) so garbage ring/tail activations are
        # annihilated, pad classes to 128 lanes, row index = c*NP + p.
        wfc = p["fc.weight"].reshape(n_cls, hid, H, W).transpose(1, 2, 3, 0)
        wfc = jnp.pad(wfc, ((0, 0), (1, 1), (1, 1), (0, NCP - n_cls)))
        wfc = wfc.reshape(hid, NPIX, NCP)
        wfc = jnp.pad(wfc, ((0, 0), (0, NP - NPIX), (0, 0))).reshape(hid * NP, NCP)

        idx = jnp.arange(NP)
        r, c = idx // PW, idx % PW
        interior = (idx < NPIX) & (r >= 1) & (r <= H) & (c >= 1) & (c <= W)

        return {
            "w1": pack_conv(p["conv1.weight"], p["conv1.bias"]),
            "w2": pack_conv(p["conv2.weight"], p["conv2.bias"]),
            "wfc": wfc.astype(jnp.bfloat16),
            "bfc": jnp.pad(p["fc.bias"], (0, NCP - n_cls)).reshape(1, NCP).astype(jnp.float32),
            "mask": interior.astype(jnp.float32).reshape(1, NP),
        }

    return jax.jit(forward), pack_params


class SyntheticCNN:
    """Stand-in for the arbitrary torch nn.Module wrapped by FeatureExtractor.
    Named submodules: conv1, relu1, conv2, relu2, fc. The whole forward runs
    as ONE fused Pallas kernel; hooked layer outputs are explicit kernel
    outputs (captured pre-ReLU, as the torch forward hooks would see them)."""

    def __init__(self, key, in_ch=4, hid=8, hw=16, n_cls=10):
        k1, k2, k3, k4, k5, k6 = jax.random.split(key, 6)
        s = 0.1
        self.params = {
            "conv1.weight": s * jax.random.normal(k1, (hid, in_ch, 3, 3), jnp.float32),
            "conv1.bias":   s * jax.random.normal(k2, (hid,), jnp.float32),
            "conv2.weight": s * jax.random.normal(k3, (hid, hid, 3, 3), jnp.float32),
            "conv2.bias":   s * jax.random.normal(k4, (hid,), jnp.float32),
            "fc.weight":    s * jax.random.normal(k5, (n_cls, hid * hw * hw), jnp.float32),
            "fc.bias":      s * jax.random.normal(k6, (n_cls,), jnp.float32),
        }
        self._layer_names = ["conv1", "relu1", "conv2", "relu2", "fc"]
        self._forward, pack = build_fused_forward(in_ch, hid, hw, hw, n_cls)
        self._packed = pack(self.params)   # pre-packed once, off the hot path

    def named_modules(self):
        return list(self._layer_names)

    def __call__(self, x_nchw, hooks=None, **kwargs):
        hooks = hooks or {}
        feat1, feat2, preds = self._forward(x_nchw, self._packed)
        # hooks run on concrete device arrays, outside jit (safe side effects)
        if "conv1" in hooks:
            hooks["conv1"](feat1)
        if "conv2" in hooks:
            hooks["conv2"](feat2)
        return preds


class FeatureExtractor:
    """JAX/Pallas port of seqexplainer FeatureExtractor: runs the model and
    captures the outputs of every layer whose name contains key_word."""

    def __init__(self, model, key_word):
        self.model = model
        layers = sorted([k for k in model.named_modules() if key_word in k])
        self.features = {layer: jnp.empty((0,), jnp.float32) for layer in layers}
        self.handles = {}
        # TODO(synk): torch register_forward_hook handles (removable hooks) have
        # no JAX equivalent; we store plain Python callbacks instead.
        for layer_id in layers:
            self.handles[layer_id] = self._save_output_hook(layer_id)

    def _save_output_hook(self, layer_id):
        def fn(output):
            self.features[layer_id] = output
        return fn

    def forward(self, x, **kwargs):
        preds = self.model(x, hooks=self.handles, **kwargs)
        return (self.features, self.handles, preds)


# --------------------------- reference (check) -----------------------------

def _ref_forward(x_nchw, p):
    dn = ("NCHW", "OIHW", "NCHW")
    c1 = jax.lax.conv_general_dilated(x_nchw, p["conv1.weight"], (1, 1), "SAME",
                                      dimension_numbers=dn) + p["conv1.bias"][None, :, None, None]
    h1 = jnp.maximum(c1, 0.0)
    c2 = jax.lax.conv_general_dilated(h1, p["conv2.weight"], (1, 1), "SAME",
                                      dimension_numbers=dn) + p["conv2.bias"][None, :, None, None]
    h2 = jnp.maximum(c2, 0.0)
    flat = h2.reshape(h2.shape[0], -1)
    preds = flat @ p["fc.weight"].T + p["fc.bias"]
    return c1, c2, preds


if __name__ == "__main__":
    key = jax.random.PRNGKey(0)
    k_model, k_x = jax.random.split(key)

    model = SyntheticCNN(k_model, in_ch=4, hid=8, hw=16, n_cls=10)
    extractor = FeatureExtractor(model, key_word="conv")

    x = jax.random.normal(k_x, (2, 4, 16, 16), jnp.float32)        # NCHW input

    features, handles, preds = extractor.forward(x)
    jax.block_until_ready(preds)
    for v in features.values():
        jax.block_until_ready(v)

    # sanity check against a pure-JAX reference (loose tol: bf16 MXU operands)
    c1_ref, c2_ref, preds_ref = _ref_forward(x, model.params)
    assert features["conv1"].shape == (2, 8, 16, 16)
    assert features["conv2"].shape == (2, 8, 16, 16)
    assert preds.shape == (2, 10)
    assert jnp.allclose(features["conv1"], c1_ref, atol=2e-2, rtol=2e-2)
    assert jnp.allclose(features["conv2"], c2_ref, atol=2e-2, rtol=2e-2)
    assert jnp.allclose(preds, preds_ref, atol=2e-2, rtol=2e-2)

    print("KERNEL_OK")
</pallas_src>

<mosaic_0001>
module attributes {stable_mosaic.version = 11 : i64} {
  func.func @kernel(%arg0: i32, %arg1: memref<4x768xf32, #tpu.memory_space<vmem>>, %arg2: memref<8x80xbf16, #tpu.memory_space<vmem>>, %arg3: memref<8x80xbf16, #tpu.memory_space<vmem>>, %arg4: memref<3072x128xbf16, #tpu.memory_space<vmem>>, %arg5: memref<1x128xf32, #tpu.memory_space<vmem>>, %arg6: memref<1x384xf32, #tpu.memory_space<vmem>>, %arg7: memref<8x768xf32, #tpu.memory_space<vmem>>, %arg8: memref<8x768xf32, #tpu.memory_space<vmem>>, %arg9: memref<2x128xf32, #tpu.memory_space<vmem>>, %arg10: memref<80x768xbf16, #tpu.memory_space<vmem>>, %arg11: memref<2x3072xf32, #tpu.memory_space<vmem>>) attributes {dimension_semantics = [#tpu.dimension_semantics<parallel>], iteration_bounds = array<i64: 1>, scalar_prefetch = 0 : i64, scratch_operands = 2 : i64, tpu.core_type = #tpu.core_type<tc>, window_params = [{transform_indices = @transform_0, window_bounds = array<i64: 4, 768>}, {pipeline_mode = #tpu.pipeline_mode<synchronous>, transform_indices = @transform_1, window_bounds = array<i64: 8, 80>}, {pipeline_mode = #tpu.pipeline_mode<synchronous>, transform_indices = @transform_2, window_bounds = array<i64: 8, 80>}, {pipeline_mode = #tpu.pipeline_mode<synchronous>, transform_indices = @transform_3, window_bounds = array<i64: 3072, 128>}, {pipeline_mode = #tpu.pipeline_mode<synchronous>, transform_indices = @transform_4, window_bounds = array<i64: 1, 128>}, {pipeline_mode = #tpu.pipeline_mode<synchronous>, transform_indices = @transform_5, window_bounds = array<i64: 1, 384>}, {transform_indices = @transform_6, window_bounds = array<i64: 8, 768>}, {transform_indices = @transform_7, window_bounds = array<i64: 8, 768>}, {transform_indices = @transform_8, window_bounds = array<i64: 2, 128>}]} {
    %c0_i32 = arith.constant 0 : i32
    %0 = arith.cmpi eq, %arg0, %c0_i32 : i32
    %1 = arith.extui %0 : i1 to i32
    %c0_i32_0 = arith.constant 0 : i32
    %2 = arith.cmpi ne, %1, %c0_i32_0 : i32
    scf.if %2 {
      %cst_88 = arith.constant 0.000000e+00 : bf16
      %112 = vector.broadcast %cst_88 : bf16 to vector<72x768xbf16>
      %c0_89 = arith.constant 0 : index
      %c0_90 = arith.constant 0 : index
      %113 = vector.load %arg10[%c0_89, %c0_90] : memref<80x768xbf16, #tpu.memory_space<vmem>>, vector<72x768xbf16>
      tpu.vector_store %arg10[%c0_89, %c0_90], %112 {strides = array<i32>} : memref<80x768xbf16, #tpu.memory_space<vmem>>, vector<72x768xbf16>,
      %cst_91 = arith.constant 1.000000e+00 : bf16
      %114 = vector.broadcast %cst_91 : bf16 to vector<8x768xbf16>
      %c72 = arith.constant 72 : index
      %c0_92 = arith.constant 0 : index
      %115 = vector.load %arg10[%c72, %c0_92] : memref<80x768xbf16, #tpu.memory_space<vmem>>, vector<8x768xbf16>
      tpu.vector_store %arg10[%c72, %c0_92], %114 {strides = array<i32>} : memref<80x768xbf16, #tpu.memory_space<vmem>>, vector<8x768xbf16>,
    } else {
    }
    %c0 = arith.constant 0 : index
    %c0_1 = arith.constant 0 : index
    %3 = vector.load %arg6[%c0, %c0_1] : memref<1x384xf32, #tpu.memory_space<vmem>>, vector<1x384xf32>
    %4 = tpu.concatenate %3, %3 in 1 : vector<1x384xf32>, vector<1x384xf32> -> vector<1x768xf32>
    %c0_2 = arith.constant 0 : index
    %c0_3 = arith.constant 0 : index
    %5 = vector.load %arg1[%c0_2, %c0_3] : memref<4x768xf32, #tpu.memory_space<vmem>>, vector<4x768xf32>
    %c19_i32 = arith.constant 19 : i32
    %6 = tpu.dynamic_rotate %5 by %c19_i32 dim 1 : vector<4x768xf32>, i32 -> vector<4x768xf32>
    %7 = arith.truncf %6 : vector<4x768xf32> to vector<4x768xbf16>
    %c0_4 = arith.constant 0 : index
    %c0_5 = arith.constant 0 : index
    %8 = vector.load %arg10[%c0_4, %c0_5] : memref<80x768xbf16, #tpu.memory_space<vmem>>, vector<4x768xbf16>
    tpu.vector_store %arg10[%c0_4, %c0_5], %7 {strides = array<i32>} : memref<80x768xbf16, #tpu.memory_space<vmem>>, vector<4x768xbf16>,
    %c18_i32 = arith.constant 18 : i32
    %9 = tpu.dynamic_rotate %5 by %c18_i32 dim 1 : vector<4x768xf32>, i32 -> vector<4x768xf32>
    %10 = arith.truncf %9 : vector<4x768xf32> to vector<4x768xbf16>
    %c8 = arith.constant 8 : index
    %c0_6 = arith.constant 0 : index
    %11 = vector.load %arg10[%c8, %c0_6] : memref<80x768xbf16, #tpu.memory_space<vmem>>, vector<4x768xbf16>
    tpu.vector_store %arg10[%c8, %c0_6], %10 {strides = array<i32>} : memref<80x768xbf16, #tpu.memory_space<vmem>>, vector<4x768xbf16>,
    %c17_i32 = arith.constant 17 : i32
    %12 = tpu.dynamic_rotate %5 by %c17_i32 dim 1 : vector<4x768xf32>, i32 -> vector<4x768xf32>
    %13 = arith.truncf %12 : vector<4x768xf32> to vector<4x768xbf16>
    %c16 = arith.constant 16 : index
    %c0_7 = arith.constant 0 : index
    %14 = vector.load %arg10[%c16, %c0_7] : memref<80x768xbf16, #tpu.memory_space<vmem>>, vector<4x768xbf16>
    tpu.vector_store %arg10[%c16, %c0_7], %13 {strides = array<i32>} : memref<80x768xbf16, #tpu.memory_space<vmem>>, vector<4x768xbf16>,
    %c1_i32 = arith.constant 1 : i32
    %15 = tpu.dynamic_rotate %5 by %c1_i32 dim 1 : vector<4x768xf32>, i32 -> vector<4x768xf32>
    %16 = arith.truncf %15 : vector<4x768xf32> to vector<4x768xbf16>
    %c24 = arith.constant 24 : index
    %c0_8 = arith.constant 0 : index
    %17 = vector.load %arg10[%c24, %c0_8] : memref<80x768xbf16, #tpu.memory_space<vmem>>, vector<4x768xbf16>
    tpu.vector_store %arg10[%c24, %c0_8], %16 {strides = array<i32>} : memref<80x768xbf16, #tpu.memory_space<vmem>>, vector<4x768xbf16>,
    %18 = arith.truncf %5 : vector<4x768xf32> to vector<4x768xbf16>
    %c32 = arith.constant 32 : index
    %c0_9 = arith.constant 0 : index
    %19 = vector.load %arg10[%c32, %c0_9] : memref<80x768xbf16, #tpu.memory_space<vmem>>, vector<4x768xbf16>
    tpu.vector_store %arg10[%c32, %c0_9], %18 {strides = array<i32>} : memref<80x768xbf16, #tpu.memory_space<vmem>>, vector<4x768xbf16>,
    %c767_i32 = arith.constant 767 : i32
    %20 = tpu.dynamic_rotate %5 by %c767_i32 dim 1 : vector<4x768xf32>, i32 -> vector<4x768xf32>
    %21 = arith.truncf %20 : vector<4x768xf32> to vector<4x768xbf16>
    %c40 = arith.constant 40 : index
    %c0_10 = arith.constant 0 : index
    %22 = vector.load %arg10[%c40, %c0_10] : memref<80x768xbf16, #tpu.memory_space<vmem>>, vector<4x768xbf16>
    tpu.vector_store %arg10[%c40, %c0_10], %21 {strides = array<i32>} : memref<80x768xbf16, #tpu.memory_space<vmem>>, vector<4x768xbf16>,
    %c751_i32 = arith.constant 751 : i32
    %23 = tpu.dynamic_rotate %5 by %c751_i32 dim 1 : vector<4x768xf32>, i32 -> vector<4x768xf32>
    %24 = arith.truncf %23 : vector<4x768xf32> to vector<4x768xbf16>
    %c48 = arith.constant 48 : index
    %c0_11 = arith.constant 0 : index
    %25 = vector.load %arg10[%c48, %c0_11] : memref<80x768xbf16, #tpu.memory_space<vmem>>, vector<4x768xbf16>
    tpu.vector_store %arg10[%c48, %c0_11], %24 {strides = array<i32>} : memref<80x768xbf16, #tpu.memory_space<vmem>>, vector<4x768xbf16>,
    %c750_i32 = arith.constant 750 : i32
    %26 = tpu.dynamic_rotate %5 by %c750_i32 dim 1 : vector<4x768xf32>, i32 -> vector<4x768xf32>
    %27 = arith.truncf %26 : vector<4x768xf32> to vector<4x768xbf16>
    %c56 = arith.constant 56 : index
    %c0_12 = arith.constant 0 : index
    %28 = vector.load %arg10[%c56, %c0_12] : memref<80x768xbf16, #tpu.memory_space<vmem>>, vector<4x768xbf16>
    tpu.vector_store %arg10[%c56, %c0_12], %27 {strides = array<i32>} : memref<80x768xbf16, #tpu.memory_space<vmem>>, vector<4x768xbf16>,
    %c749_i32 = arith.constant 749 : i32
    %29 = tpu.dynamic_rotate %5 by %c749_i32 dim 1 : vector<4x768xf32>, i32 -> vector<4x768xf32>
    %30 = arith.truncf %29 : vector<4x768xf32> to vector<4x768xbf16>
    %c64 = arith.constant 64 : index
    %c0_13 = arith.constant 0 : index
    %31 = vector.load %arg10[%c64, %c0_13] : memref<80x768xbf16, #tpu.memory_space<vmem>>, vector<4x768xbf16>
    tpu.vector_store %arg10[%c64, %c0_13], %30 {strides = array<i32>} : memref<80x768xbf16, #tpu.memory_space<vmem>>, vector<4x768xbf16>,
    %c0_14 = arith.constant 0 : index
    %c0_15 = arith.constant 0 : index
    %32 = vector.load %arg2[%c0_14, %c0_15] : memref<8x80xbf16, #tpu.memory_space<vmem>>, vector<8x80xbf16>
    %c0_16 = arith.constant 0 : index
    %c0_17 = arith.constant 0 : index
    %33 = vector.load %arg10[%c0_16, %c0_17] : memref<80x768xbf16, #tpu.memory_space<vmem>>, vector<80x768xbf16>
    %cst = arith.constant dense<0.000000e+00> : vector<8x768xf32>
    %34 = tpu.matmul %32, %33, %cst {dimension_numbers = #tpu.dot_dimension_numbers<[1], [0], [0], [1], [0, 0, 1, 1], [], []>} : vector<8x80xbf16>, vector<80x768xbf16>, vector<8x768xf32> -> vector<8x768xf32>
    %c0_18 = arith.constant 0 : index
    %c0_19 = arith.constant 0 : index
    %35 = vector.load %arg7[%c0_18, %c0_19] : memref<8x768xf32, #tpu.memory_space<vmem>>, vector<8x768xf32>
    tpu.vector_store %arg7[%c0_18, %c0_19], %34 {strides = array<i32>} : memref<8x768xf32, #tpu.memory_space<vmem>>, vector<8x768xf32>,
    %cst_20 = arith.constant 0.000000e+00 : f32
    %36 = vector.broadcast %cst_20 : f32 to vector<8x768xf32>
    %37 = arith.maximumf %34, %36 : vector<8x768xf32>
    %38 = vector.broadcast %4 : vector<1x768xf32> to vector<8x768xf32>
    %39 = arith.mulf %37, %38 : vector<8x768xf32>
    %c19_i32_21 = arith.constant 19 : i32
    %40 = tpu.dynamic_rotate %39 by %c19_i32_21 dim 1 : vector<8x768xf32>, i32 -> vector<8x768xf32>
    %41 = arith.truncf %40 : vector<8x768xf32> to vector<8x768xbf16>
    %c0_22 = arith.constant 0 : index
    %c0_23 = arith.constant 0 : index
    %42 = vector.load %arg10[%c0_22, %c0_23] : memref<80x768xbf16, #tpu.memory_space<vmem>>, vector<8x768xbf16>
    tpu.vector_store %arg10[%c0_22, %c0_23], %41 {strides = array<i32>} : memref<80x768xbf16, #tpu.memory_space<vmem>>, vector<8x768xbf16>,
    %c18_i32_24 = arith.constant 18 : i32
    %43 = tpu.dynamic_rotate %39 by %c18_i32_24 dim 1 : vector<8x768xf32>, i32 -> vector<8x768xf32>
    %44 = arith.truncf %43 : vector<8x768xf32> to vector<8x768xbf16>
    %c8_25 = arith.constant 8 : index
    %c0_26 = arith.constant 0 : index
    %45 = vector.load %arg10[%c8_25, %c0_26] : memref<80x768xbf16, #tpu.memory_space<vmem>>, vector<8x768xbf16>
    tpu.vector_store %arg10[%c8_25, %c0_26], %44 {strides = array<i32>} : memref<80x768xbf16, #tpu.memory_space<vmem>>, vector<8x768xbf16>,
    %c17_i32_27 = arith.constant 17 : i32
    %46 = tpu.dynamic_rotate %39 by %c17_i32_27 dim 1 : vector<8x768xf32>, i32 -> vector<8x768xf32>
    %47 = arith.truncf %46 : vector<8x768xf32> to vector<8x768xbf16>
    %c16_28 = arith.constant 16 : index
    %c0_29 = arith.constant 0 : index
    %48 = vector.load %arg10[%c16_28, %c0_29] : memref<80x768xbf16, #tpu.memory_space<vmem>>, vector<8x768xbf16>
    tpu.vector_store %arg10[%c16_28, %c0_29], %47 {strides = array<i32>} : memref<80x768xbf16, #tpu.memory_space<vmem>>, vector<8x768xbf16>,
    %c1_i32_30 = arith.constant 1 : i32
    %49 = tpu.dynamic_rotate %39 by %c1_i32_30 dim 1 : vector<8x768xf32>, i32 -> vector<8x768xf32>
    %50 = arith.truncf %49 : vector<8x768xf32> to vector<8x768xbf16>
    %c24_31 = arith.constant 24 : index
    %c0_32 = arith.constant 0 : index
    %51 = vector.load %arg10[%c24_31, %c0_32] : memref<80x768xbf16, #tpu.memory_space<vmem>>, vector<8x768xbf16>
    tpu.vector_store %arg10[%c24_31, %c0_32], %50 {strides = array<i32>} : memref<80x768xbf16, #tpu.memory_space<vmem>>, vector<8x768xbf16>,
    %52 = arith.truncf %39 : vector<8x768xf32> to vector<8x768xbf16>
    %c32_33 = arith.constant 32 : index
    %c0_34 = arith.constant 0 : index
    %53 = vector.load %arg10[%c32_33, %c0_34] : memref<80x768xbf16, #tpu.memory_space<vmem>>, vector<8x768xbf16>
    tpu.vector_store %arg10[%c32_33, %c0_34], %52 {strides = array<i32>} : memref<80x768xbf16, #tpu.memory_space<vmem>>, vector<8x768xbf16>,
    %c767_i32_35 = arith.constant 767 : i32
    %54 = tpu.dynamic_rotate %39 by %c767_i32_35 dim 1 : vector<8x768xf32>, i32 -> vector<8x768xf32>
    %55 = arith.truncf %54 : vector<8x768xf32> to vector<8x768xbf16>
    %c40_36 = arith.constant 40 : index
    %c0_37 = arith.constant 0 : index
    %56 = vector.load %arg10[%c40_36, %c0_37] : memref<80x768xbf16, #tpu.memory_space<vmem>>, vector<8x768xbf16>
    tpu.vector_store %arg10[%c40_36, %c0_37], %55 {strides = array<i32>} : memref<80x768xbf16, #tpu.memory_space<vmem>>, vector<8x768xbf16>,
    %c751_i32_38 = arith.constant 751 : i32
    %57 = tpu.dynamic_rotate %39 by %c751_i32_38 dim 1 : vector<8x768xf32>, i32 -> vector<8x768xf32>
    %58 = arith.truncf %57 : vector<8x768xf32> to vector<8x768xbf16>
    %c48_39 = arith.constant 48 : index
    %c0_40 = arith.constant 0 : index
    %59 = vector.load %arg10[%c48_39, %c0_40] : memref<80x768xbf16, #tpu.memory_space<vmem>>, vector<8x768xbf16>
    tpu.vector_store %arg10[%c48_39, %c0_40], %58 {strides = array<i32>} : memref<80x768xbf16, #tpu.memory_space<vmem>>, vector<8x768xbf16>,
    %c750_i32_41 = arith.constant 750 : i32
    %60 = tpu.dynamic_rotate %39 by %c750_i32_41 dim 1 : vector<8x768xf32>, i32 -> vector<8x768xf32>
    %61 = arith.truncf %60 : vector<8x768xf32> to vector<8x768xbf16>
    %c56_42 = arith.constant 56 : index
    %c0_43 = arith.constant 0 : index
    %62 = vector.load %arg10[%c56_42, %c0_43] : memref<80x768xbf16, #tpu.memory_space<vmem>>, vector<8x768xbf16>
    tpu.vector_store %arg10[%c56_42, %c0_43], %61 {strides = array<i32>} : memref<80x768xbf16, #tpu.memory_space<vmem>>, vector<8x768xbf16>,
    %c749_i32_44 = arith.constant 749 : i32
    %63 = tpu.dynamic_rotate %39 by %c749_i32_44 dim 1 : vector<8x768xf32>, i32 -> vector<8x768xf32>
    %64 = arith.truncf %63 : vector<8x768xf32> to vector<8x768xbf16>
    %c64_45 = arith.constant 64 : index
    %c0_46 = arith.constant 0 : index
    %65 = vector.load %arg10[%c64_45, %c0_46] : memref<80x768xbf16, #tpu.memory_space<vmem>>, vector<8x768xbf16>
    tpu.vector_store %arg10[%c64_45, %c0_46], %64 {strides = array<i32>} : memref<80x768xbf16, #tpu.memory_space<vmem>>, vector<8x768xbf16>,
    %c0_47 = arith.constant 0 : index
    %c0_48 = arith.constant 0 : index
    %66 = vector.load %arg3[%c0_47, %c0_48] : memref<8x80xbf16, #tpu.memory_space<vmem>>, vector<8x80xbf16>
    %c0_49 = arith.constant 0 : index
    %c0_50 = arith.constant 0 : index
    %67 = vector.load %arg10[%c0_49, %c0_50] : memref<80x768xbf16, #tpu.memory_space<vmem>>, vector<80x768xbf16>
    %cst_51 = arith.constant dense<0.000000e+00> : vector<8x768xf32>
    %68 = tpu.matmul %66, %67, %cst_51 {dimension_numbers = #tpu.dot_dimension_numbers<[1], [0], [0], [1], [0, 0, 1, 1], [], []>} : vector<8x80xbf16>, vector<80x768xbf16>, vector<8x768xf32> -> vector<8x768xf32>
    %c0_52 = arith.constant 0 : index
    %c0_53 = arith.constant 0 : index
    %69 = vector.load %arg8[%c0_52, %c0_53] : memref<8x768xf32, #tpu.memory_space<vmem>>, vector<8x768xf32>
    tpu.vector_store %arg8[%c0_52, %c0_53], %68 {strides = array<i32>} : memref<8x768xf32, #tpu.memory_space<vmem>>, vector<8x768xf32>,
    %cst_54 = arith.constant 0.000000e+00 : f32
    %70 = vector.broadcast %cst_54 : f32 to vector<8x768xf32>
    %71 = arith.maximumf %68, %70 : vector<8x768xf32>
    %72 = vector.extract_strided_slice %71 {offsets = [0, 0], sizes = [1, 384], strides = [1, 1]} : vector<8x768xf32> to vector<1x384xf32>
    %c0_55 = arith.constant 0 : index
    %c0_56 = arith.constant 0 : index
    %73 = vector.load %arg11[%c0_55, %c0_56] : memref<2x3072xf32, #tpu.memory_space<vmem>>, vector<1x384xf32>
    tpu.vector_store %arg11[%c0_55, %c0_56], %72 {strides = array<i32>} : memref<2x3072xf32, #tpu.memory_space<vmem>>, vector<1x384xf32>,
    %74 = vector.extract_strided_slice %71 {offsets = [1, 0], sizes = [1, 384], strides = [1, 1]} : vector<8x768xf32> to vector<1x384xf32>
    %c0_57 = arith.constant 0 : index
    %c384 = arith.constant 384 : index
    %75 = vector.load %arg11[%c0_57, %c384] : memref<2x3072xf32, #tpu.memory_space<vmem>>, vector<1x384xf32>
    tpu.vector_store %arg11[%c0_57, %c384], %74 {strides = array<i32>} : memref<2x3072xf32, #tpu.memory_space<vmem>>, vector<1x384xf32>,
    %76 = vector.extract_strided_slice %71 {offsets = [2, 0], sizes = [1, 384], strides = [1, 1]} : vector<8x768xf32> to vector<1x384xf32>
    %c0_58 = arith.constant 0 : index
    %c768 = arith.constant 768 : index
    %77 = vector.load %arg11[%c0_58, %c768] : memref<2x3072xf32, #tpu.memory_space<vmem>>, vector<1x384xf32>
    tpu.vector_store %arg11[%c0_58, %c768], %76 {strides = array<i32>} : memref<2x3072xf32, #tpu.memory_space<vmem>>, vector<1x384xf32>,
    %78 = vector.extract_strided_slice %71 {offsets = [3, 0], sizes = [1, 384], strides = [1, 1]} : vector<8x768xf32> to vector<1x384xf32>
    %c0_59 = arith.constant 0 : index
    %c1152 = arith.constant 1152 : index
    %79 = vector.load %arg11[%c0_59, %c1152] : memref<2x3072xf32, #tpu.memory_space<vmem>>, vector<1x384xf32>
    tpu.vector_store %arg11[%c0_59, %c1152], %78 {strides = array<i32>} : memref<2x3072xf32, #tpu.memory_space<vmem>>, vector<1x384xf32>,
    %80 = vector.extract_strided_slice %71 {offsets = [4, 0], sizes = [1, 384], strides = [1, 1]} : vector<8x768xf32> to vector<1x384xf32>
    %c0_60 = arith.constant 0 : index
    %c1536 = arith.constant 1536 : index
    %81 = vector.load %arg11[%c0_60, %c1536] : memref<2x3072xf32, #tpu.memory_space<vmem>>, vector<1x384xf32>
    tpu.vector_store %arg11[%c0_60, %c1536], %80 {strides = array<i32>} : memref<2x3072xf32, #tpu.memory_space<vmem>>, vector<1x384xf32>,
    %82 = vector.extract_strided_slice %71 {offsets = [5, 0], sizes = [1, 384], strides = [1, 1]} : vector<8x768xf32> to vector<1x384xf32>
    %c0_61 = arith.constant 0 : index
    %c1920 = arith.constant 1920 : index
    %83 = vector.load %arg11[%c0_61, %c1920] : memref<2x3072xf32, #tpu.memory_space<vmem>>, vector<1x384xf32>
    tpu.vector_store %arg11[%c0_61, %c1920], %82 {strides = array<i32>} : memref<2x3072xf32, #tpu.memory_space<vmem>>, vector<1x384xf32>,
    %84 = vector.extract_strided_slice %71 {offsets = [6, 0], sizes = [1, 384], strides = [1, 1]} : vector<8x768xf32> to vector<1x384xf32>
    %c0_62 = arith.constant 0 : index
    %c2304 = arith.constant 2304 : index
    %85 = vector.load %arg11[%c0_62, %c2304] : memref<2x3072xf32, #tpu.memory_space<vmem>>, vector<1x384xf32>
    tpu.vector_store %arg11[%c0_62, %c2304], %84 {strides = array<i32>} : memref<2x3072xf32, #tpu.memory_space<vmem>>, vector<1x384xf32>,
    %86 = vector.extract_strided_slice %71 {offsets = [7, 0], sizes = [1, 384], strides = [1, 1]} : vector<8x768xf32> to vector<1x384xf32>
    %c0_63 = arith.constant 0 : index
    %c2688 = arith.constant 2688 : index
    %87 = vector.load %arg11[%c0_63, %c2688] : memref<2x3072xf32, #tpu.memory_space<vmem>>, vector<1x384xf32>
    tpu.vector_store %arg11[%c0_63, %c2688], %86 {strides = array<i32>} : memref<2x3072xf32, #tpu.memory_space<vmem>>, vector<1x384xf32>,
    %88 = vector.extract_strided_slice %71 {offsets = [0, 384], sizes = [1, 384], strides = [1, 1]} : vector<8x768xf32> to vector<1x384xf32>
    %c1 = arith.constant 1 : index
    %c0_64 = arith.constant 0 : index
    %89 = vector.load %arg11[%c1, %c0_64] : memref<2x3072xf32, #tpu.memory_space<vmem>>, vector<1x384xf32>
    tpu.vector_store %arg11[%c1, %c0_64], %88 {strides = array<i32>} : memref<2x3072xf32, #tpu.memory_space<vmem>>, vector<1x384xf32>,
    %90 = vector.extract_strided_slice %71 {offsets = [1, 384], sizes = [1, 384], strides = [1, 1]} : vector<8x768xf32> to vector<1x384xf32>
    %c1_65 = arith.constant 1 : index
    %c384_66 = arith.constant 384 : index
    %91 = vector.load %arg11[%c1_65, %c384_66] : memref<2x3072xf32, #tpu.memory_space<vmem>>, vector<1x384xf32>
    tpu.vector_store %arg11[%c1_65, %c384_66], %90 {strides = array<i32>} : memref<2x3072xf32, #tpu.memory_space<vmem>>, vector<1x384xf32>,
    %92 = vector.extract_strided_slice %71 {offsets = [2, 384], sizes = [1, 384], strides = [1, 1]} : vector<8x768xf32> to vector<1x384xf32>
    %c1_67 = arith.constant 1 : index
    %c768_68 = arith.constant 768 : index
    %93 = vector.load %arg11[%c1_67, %c768_68] : memref<2x3072xf32, #tpu.memory_space<vmem>>, vector<1x384xf32>
    tpu.vector_store %arg11[%c1_67, %c768_68], %92 {strides = array<i32>} : memref<2x3072xf32, #tpu.memory_space<vmem>>, vector<1x384xf32>,
    %94 = vector.extract_strided_slice %71 {offsets = [3, 384], sizes = [1, 384], strides = [1, 1]} : vector<8x768xf32> to vector<1x384xf32>
    %c1_69 = arith.constant 1 : index
    %c1152_70 = arith.constant 1152 : index
    %95 = vector.load %arg11[%c1_69, %c1152_70] : memref<2x3072xf32, #tpu.memory_space<vmem>>, vector<1x384xf32>
    tpu.vector_store %arg11[%c1_69, %c1152_70], %94 {strides = array<i32>} : memref<2x3072xf32, #tpu.memory_space<vmem>>, vector<1x384xf32>,
    %96 = vector.extract_strided_slice %71 {offsets = [4, 384], sizes = [1, 384], strides = [1, 1]} : vector<8x768xf32> to vector<1x384xf32>
    %c1_71 = arith.constant 1 : index
    %c1536_72 = arith.constant 1536 : index
    %97 = vector.load %arg11[%c1_71, %c1536_72] : memref<2x3072xf32, #tpu.memory_space<vmem>>, vector<1x384xf32>
    tpu.vector_store %arg11[%c1_71, %c1536_72], %96 {strides = array<i32>} : memref<2x3072xf32, #tpu.memory_space<vmem>>, vector<1x384xf32>,
    %98 = vector.extract_strided_slice %71 {offsets = [5, 384], sizes = [1, 384], strides = [1, 1]} : vector<8x768xf32> to vector<1x384xf32>
    %c1_73 = arith.constant 1 : index
    %c1920_74 = arith.constant 1920 : index
    %99 = vector.load %arg11[%c1_73, %c1920_74] : memref<2x3072xf32, #tpu.memory_space<vmem>>, vector<1x384xf32>
    tpu.vector_store %arg11[%c1_73, %c1920_74], %98 {strides = array<i32>} : memref<2x3072xf32, #tpu.memory_space<vmem>>, vector<1x384xf32>,
    %100 = vector.extract_strided_slice %71 {offsets = [6, 384], sizes = [1, 384], strides = [1, 1]} : vector<8x768xf32> to vector<1x384xf32>
    %c1_75 = arith.constant 1 : index
    %c2304_76 = arith.constant 2304 : index
    %101 = vector.load %arg11[%c1_75, %c2304_76] : memref<2x3072xf32, #tpu.memory_space<vmem>>, vector<1x384xf32>
    tpu.vector_store %arg11[%c1_75, %c2304_76], %100 {strides = array<i32>} : memref<2x3072xf32, #tpu.memory_space<vmem>>, vector<1x384xf32>,
    %102 = vector.extract_strided_slice %71 {offsets = [7, 384], sizes = [1, 384], strides = [1, 1]} : vector<8x768xf32> to vector<1x384xf32>
    %c1_77 = arith.constant 1 : index
    %c2688_78 = arith.constant 2688 : index
    %103 = vector.load %arg11[%c1_77, %c2688_78] : memref<2x3072xf32, #tpu.memory_space<vmem>>, vector<1x384xf32>
    tpu.vector_store %arg11[%c1_77, %c2688_78], %102 {strides = array<i32>} : memref<2x3072xf32, #tpu.memory_space<vmem>>, vector<1x384xf32>,
    %c0_79 = arith.constant 0 : index
    %c0_80 = arith.constant 0 : index
    %104 = vector.load %arg11[%c0_79, %c0_80] : memref<2x3072xf32, #tpu.memory_space<vmem>>, vector<2x3072xf32>
    %105 = arith.truncf %104 : vector<2x3072xf32> to vector<2x3072xbf16>
    %c0_81 = arith.constant 0 : index
    %c0_82 = arith.constant 0 : index
    %106 = vector.load %arg4[%c0_81, %c0_82] : memref<3072x128xbf16, #tpu.memory_space<vmem>>, vector<3072x128xbf16>
    %cst_83 = arith.constant dense<0.000000e+00> : vector<2x128xf32>
    %107 = tpu.matmul %105, %106, %cst_83 {dimension_numbers = #tpu.dot_dimension_numbers<[1], [0], [0], [1], [0, 0, 1, 1], [], []>} : vector<2x3072xbf16>, vector<3072x128xbf16>, vector<2x128xf32> -> vector<2x128xf32>
    %c0_84 = arith.constant 0 : index
    %c0_85 = arith.constant 0 : index
    %108 = vector.load %arg5[%c0_84, %c0_85] : memref<1x128xf32, #tpu.memory_space<vmem>>, vector<1x128xf32>
    %109 = vector.broadcast %108 : vector<1x128xf32> to vector<2x128xf32>
    %110 = arith.addf %107, %109 : vector<2x128xf32>
    %c0_86 = arith.constant 0 : index
    %c0_87 = arith.constant 0 : index
    %111 = vector.load %arg9[%c0_86, %c0_87] : memref<2x128xf32, #tpu.memory_space<vmem>>, vector<2x128xf32>
    tpu.vector_store %arg9[%c0_86, %c0_87], %110 {strides = array<i32>} : memref<2x128xf32, #tpu.memory_space<vmem>>, vector<2x128xf32>,
    return
  }
  func.func @transform_0(%arg0: i32) -> (i32, i32) {
    %c0_i32 = arith.constant 0 : i32
    %c0_i32_0 = arith.constant 0 : i32
    return %c0_i32, %arg0 : i32, i32
  }
  func.func @transform_1(%arg0: i32) -> (i32, i32) {
    %c0_i32 = arith.constant 0 : i32
    %c0_i32_0 = arith.constant 0 : i32
    %c0_i32_1 = arith.constant 0 : i32
    return %c0_i32, %c0_i32_0 : i32, i32
  }
  func.func @transform_2(%arg0: i32) -> (i32, i32) {
    %c0_i32 = arith.constant 0 : i32
    %c0_i32_0 = arith.constant 0 : i32
    %c0_i32_1 = arith.constant 0 : i32
    return %c0_i32, %c0_i32_0 : i32, i32
  }
  func.func @transform_3(%arg0: i32) -> (i32, i32) {
    %c0_i32 = arith.constant 0 : i32
    %c0_i32_0 = arith.constant 0 : i32
    %c0_i32_1 = arith.constant 0 : i32
    return %c0_i32, %c0_i32_0 : i32, i32
  }
  func.func @transform_4(%arg0: i32) -> (i32, i32) {
    %c0_i32 = arith.constant 0 : i32
    %c0_i32_0 = arith.constant 0 : i32
    %c0_i32_1 = arith.constant 0 : i32
    return %c0_i32, %c0_i32_0 : i32, i32
  }
  func.func @transform_5(%arg0: i32) -> (i32, i32) {
    %c0_i32 = arith.constant 0 : i32
    %c0_i32_0 = arith.constant 0 : i32
    %c0_i32_1 = arith.constant 0 : i32
    return %c0_i32, %c0_i32_0 : i32, i32
  }
  func.func @transform_6(%arg0: i32) -> (i32, i32) {
    %c0_i32 = arith.constant 0 : i32
    %c0_i32_0 = arith.constant 0 : i32
    return %c0_i32, %arg0 : i32, i32
  }
  func.func @transform_7(%arg0: i32) -> (i32, i32) {
    %c0_i32 = arith.constant 0 : i32
    %c0_i32_0 = arith.constant 0 : i32
    return %c0_i32, %arg0 : i32, i32
  }
  func.func @transform_8(%arg0: i32) -> (i32, i32) {
    %c0_i32 = arith.constant 0 : i32
    %c0_i32_0 = arith.constant 0 : i32
    return %arg0, %c0_i32 : i32, i32
  }
}

</mosaic_0001>

<bundles_post_ra>
// kernel: forward.1
= control target key start
LH: loop header
LB: loop body
LE: loop exit
PB: predicated region body
PF: predicated region fallthrough
CT: control target
= control target key end

     0   :  { %14 = vsyncpa [#allocation5], 0  ;;  %s5218_s0 = inlined_call_operand.vmem [shape: f32[4,768], index: 0, kind: input, shape index: {}]   ;;  %s5219_s1 = inlined_call_operand.vmem [shape: bf16[8,80], index: 1, kind: input, shape index: {}]   ;;  %s5220_s2 = inlined_call_operand.vmem [shape: bf16[8,80], index: 2, kind: input, shape index: {}]   ;;  %s5221_s3 = inlined_call_operand.hbm [shape: bf16[3072,128], index: 3, kind: input, shape index: {}]   ;;  %s5222_s4 = inlined_call_operand.vmem [shape: f32[1,128], index: 4, kind: input, shape index: {}]   ;;  %s5223_s5 = inlined_call_operand.vmem [shape: f32[1,384], index: 5, kind: input, shape index: {}]   ;;  %s5224_s6 = inlined_call_operand.vmem [shape: f32[8,768], index: 6, kind: output, shape index: {0}]   ;;  %s5225_s7 = inlined_call_operand.vmem [shape: f32[8,768], index: 7, kind: output, shape index: {1}]   ;;  %s5226_s8 = inlined_call_operand.hbm [shape: f32[2,128], index: 8, kind: output, shape index: {2}]  }
   0x1   :  { %15 = vsyncpa [#allocation6], 0  ;;  %s4446_s27 = smov [#allocation4]   ;;  %s4398_s9 = scalar_lea.hbm %s5221_s3, 24576 }
   0x2   :  { %s27_s28 = sshll.u32 %s4446_s27, 4  ;;  %p4399_p0 = scmp.ne.s32.totalorder %s5221_s3, %s4398_s9  ;;  %s28_s28 = int_to_ptr.vmem [resolvable:$true] %s27_s28 }
   0x3   :  { %p4402_p1 = scmp.lt.u32.totalorder %s4398_s9, %s5221_s3 }
   0x5   :  { %p4404_p2 = pnand %p4402_p1, %p4399_p0 }
   0x7   :  { %4407 = shalt.err (!%p4404_p2)
}
   0x8   :  { %s4408_s14 = scalar_lea.vmem %s28_s28, 24576  ;;  %p4413_p4 = scmp.lt.s32.totalorder %s28_s28, %s28_s28 }
   0x9   :  { %p4409_p3 = scmp.ne.s32.totalorder %s28_s28, %s4408_s14  ;;  %p4414_p5 = scmp.lt.s32.totalorder %s4408_s14, %s4408_s14 }
   0xb   :  { %p4415_p6 = por %p4414_p5, %p4413_p4 }
   0xd   :  { %p4416_p7 = pnand %p4415_p6, %p4409_p3 }
   0xf   :  { %4419 = shalt.err (!%p4416_p7)
}
  0x10   :  { %s4447_s15 = smov 64   ;;  %s4448_s16 = smov 4  }
  0x11   :  { %33 = dma.hbm_to_vmem [thread:$0]  %s5221_s3, 24576, %s28_s28, [#allocation5], %s4447_s15, %s4447_s15, %s4448_s16  }
  0x12   :  { %4442 = dma.done.wait [#allocation5], 24576  }
  0x13   :  { %4443 = vsyncadd [#allocation5], 4294942720  ;;  %v4449_v0 = vmov 0   ;;  %v100_v1 = vld [vmem:[%s5218_s0] sm:$0xff]  ;;  %v102_v2 = vld [vmem:[%s5218_s0 + $0x10] sm:$0xff]  ;;  %s4450_s22 = smov 19   ;;  %v85_v19 = vlaneseq }
  0x14   :  { %48 = vst [vmem:[#allocation2 + $0x8] sm:$0xff] %v4449_v0  ;;  %47 = vst [vmem:[#allocation2] sm:$0xff] %v4449_v0  ;;  %513 = vmatprep.mubr.bf16.mxu0 %v4449_v0  ;;  %554 = vmatprep.mubr.bf16.mxu1 %v4449_v0  ;;  %v106_v3 = vcombine.high %v100_v1, %v100_v1  ;;  %v108_v4 = vcombine.high %v102_v2, %v102_v2  ;;  %s4451_s23 = smov 18   ;;  %s4452_s24 = smov 1   ;;  %v101_v9 = vld [vmem:[%s5218_s0 + $0x8] sm:$0xff]  ;;  %vm477_vm8 = vcmask 654336  }
  0x15   :  { %49 = vst [vmem:[#allocation2 + $0x10] sm:$0xff] %v4449_v0  ;;  %50 = vst [vmem:[#allocation2 + $0x18] sm:$0xff] %v4449_v0  ;;  %v274_v7 = vpack.c.bf16 %v100_v1, %v100_v1  ;;  %s4453_s27 = smov 17   ;;  %s4454_s28 = smov 127   ;;  %v4456_v11 = vmov 1065369472   ;;  %v107_v12 = vcombine.high %v101_v9, %v101_v9  ;;  %v278_v15 = vpack.c.bf16 %v102_v2, %v102_v2 }
  0x16   :  { %51 = vst [vmem:[#allocation2 + $0x20] sm:$0xff] %v4449_v0  ;;  %52 = vst [vmem:[#allocation2 + $0x28] sm:$0xff] %v4449_v0  ;;  %v4016_v5 = vpack.i.bf16 %v106_v3, %v100_v1  ;;  %v4021_v6 = vpack.i.bf16 %v102_v2, %v108_v4  ;;  %v275_v8 = vpack.c.bf16 %v106_v3, %v106_v3  ;;  %s4455_s29 = smov 110   ;;  %s4457_s0 = smov 111   ;;  %v4558_v20 = vand.u32 127, %v85_v19 }
  0x17   :  { %53 = vst [vmem:[#allocation2 + $0x30] sm:$0xff] %v4449_v0  ;;  %54 = vst [vmem:[#allocation2 + $0x38] sm:$0xff] %v4449_v0  ;;  %v4041_v10 = vpack.i.bf16 %v101_v9, %v106_v3  ;;  %s4458_s30 = smov 109   ;;  %v4066_v13 = vpack.i.bf16 %v101_v9, %v107_v12  ;;  %v4076_v14 = vpack.i.bf16 %v107_v12, %v102_v2  ;;  %vm5092_vm9 = vcmp.lt.s32.totalorder %v85_v19, 384 }
  0x18   :  { %55 = vst [vmem:[#allocation2 + $0x40] sm:$0xff] %v4449_v0  ;;  %56 = vst [vmem:[#allocation2 + $0x48] sm:$0xff] %v4449_v0  ;;  %4017 = vrot.lane.b32.xlu1 %v4016_v5, %s4450_s22  ;;  %4007 = vrot.lane.b32.xlu0 %v4016_v5, %s4451_s23  ;;  %v279_v16 = vpack.c.bf16 %v108_v4, %v108_v4  ;;  %v276_v17 = vpack.c.bf16 %v101_v9, %v101_v9  ;;  %vm126_vm0 = vcmp.lt.s32.totalorder %v4558_v20, 19 }
  0x19   :  { %57 = vst [vmem:[#allocation2 + $0x50] sm:$0xff] %v4449_v0  ;;  %58 = vst [vmem:[#allocation2 + $0x58] sm:$0xff] %v4449_v0  ;;  %v277_v18 = vpack.c.bf16 %v107_v12, %v107_v12  ;;  %vm157_vm1 = vcmp.lt.s32.totalorder %v4558_v20, 18  ;;  %vm237_vm2 = vcmp.lt.s32.totalorder %v4558_v20, 1  ;;  %vm206_vm3 = vcmp.lt.s32.totalorder %v4558_v20, 17 }
  0x1a   :  { %59 = vst [vmem:[#allocation2 + $0x60] sm:$0xff] %v4449_v0  ;;  %60 = vst [vmem:[#allocation2 + $0x68] sm:$0xff] %v4449_v0  ;;  %vm298_vm4 = vcmp.lt.s32.totalorder %v4558_v20, 127  ;;  %vm378_vm5 = vcmp.lt.s32.totalorder %v4558_v20, 110  ;;  %vm347_vm6 = vcmp.lt.s32.totalorder %v4558_v20, 111  ;;  %vm427_vm7 = vcmp.lt.s32.totalorder %v4558_v20, 109 }
  0x1b   :  { %61 = vst [vmem:[#allocation2 + $0x70] sm:$0xff] %v4449_v0  ;;  %62 = vst [vmem:[#allocation2 + $0x78] sm:$0xff] %v4449_v0 }
  0x1c   :  { %63 = vst [vmem:[#allocation2 + $0x80] sm:$0xff] %v4449_v0  ;;  %64 = vst [vmem:[#allocation2 + $0x88] sm:$0xff] %v4449_v0  ;;  %4022 = vrot.lane.b32.xlu1 %v4021_v6, %s4450_s22  ;;  %4012 = vrot.lane.b32.xlu0 %v4021_v6, %s4451_s23 }
  0x1d   :  { %65 = vst [vmem:[#allocation2 + $0x90] sm:$0xff] %v4449_v0  ;;  %66 = vst [vmem:[#allocation2 + $0x98] sm:$0xff] %v4449_v0 }
  0x1e   :  { %67 = vst [vmem:[#allocation2 + $0xa0] sm:$0xff] %v4449_v0  ;;  %68 = vst [vmem:[#allocation2 + $0xa8] sm:$0xff] %v4449_v0 }
  0x1f   :  { %69 = vst [vmem:[#allocation2 + $0xb0] sm:$0xff] %v4449_v0  ;;  %70 = vst [vmem:[#allocation2 + $0xb8] sm:$0xff] %v4449_v0 }
  0x20   :  { %71 = vst [vmem:[#allocation2 + $0xc0] sm:$0xf] %v4449_v0  ;;  %72 = vst [vmem:[#allocation2 + $0xc8] sm:$0xf] %v4449_v0  ;;  %4032 = vrot.lane.b32.xlu1 %v4021_v6, %s4452_s24  ;;  %4027 = vrot.lane.b32.xlu0 %v4016_v5, %s4452_s24 }
  0x21   :  { %73 = vst [vmem:[#allocation2 + $0xd0] sm:$0xf] %v4449_v0  ;;  %74 = vst [vmem:[#allocation2 + $0xd8] sm:$0xf] %v4449_v0 }
  0x22   :  { %75 = vst [vmem:[#allocation2 + $0xe0] sm:$0xf] %v4449_v0  ;;  %76 = vst [vmem:[#allocation2 + $0xe8] sm:$0xf] %v4449_v0 }
  0x23   :  { %280 = vst [vmem:[#allocation2 + $0x60] sm:$0x3] %v274_v7  ;;  %281 = vst [vmem:[#allocation2 + $0x68] sm:$0x3] %v275_v8 }
  0x24   :  { %204 = vrot.lane.b32.xlu1 %v108_v4, %s4453_s27  ;;  %4037 = vrot.lane.b32.xlu0 %v4016_v5, %s4453_s27  ;;  %78 = vst [vmem:[#allocation2 + $0xc8] sm:$0xf0] %v4456_v11  ;;  %77 = vst [vmem:[#allocation2 + $0xc0] sm:$0xf0] %v4456_v11 }
  0x25   :  { %79 = vst [vmem:[#allocation2 + $0xd0] sm:$0xf0] %v4456_v11  ;;  %80 = vst [vmem:[#allocation2 + $0xd8] sm:$0xf0] %v4456_v11 }
  0x26   :  { %81 = vst [vmem:[#allocation2 + $0xe0] sm:$0xf0] %v4456_v11  ;;  %82 = vst [vmem:[#allocation2 + $0xe8] sm:$0xf0] %v4456_v11 }
  0x27   :  { %284 = vst [vmem:[#allocation2 + $0x80] sm:$0x3] %v278_v15  ;;  %285 = vst [vmem:[#allocation2 + $0x88] sm:$0x3] %v279_v16 }
  0x28   :  { %286 = vrot.lane.b32.xlu1 %v100_v1, %s4454_s28  ;;  %4042 = vrot.lane.b32.xlu0 %v4041_v10, %s4454_s28  ;;  %282 = vst [vmem:[#allocation2 + $0x70] sm:$0x3] %v276_v17  ;;  %283 = vst [vmem:[#allocation2 + $0x78] sm:$0x3] %v277_v18 }
  0x2c   :  { %366 = vrot.lane.b32.xlu1 %v100_v1, %s4455_s29  ;;  %4047 = vrot.lane.b32.xlu0 %v4041_v10, %s4455_s29 }
  0x30   :  { %335 = vrot.lane.b32.xlu1 %v100_v1, %s4457_s0  ;;  %4052 = vrot.lane.b32.xlu0 %v4041_v10, %s4457_s0 }
  0x34   :  { %415 = vrot.lane.b32.xlu1 %v100_v1, %s4458_s30  ;;  %4057 = vrot.lane.b32.xlu0 %v4041_v10, %s4458_s30 }
  0x38   :  { %4067 = vrot.lane.b32.xlu1 %v4066_v13, %s4450_s22  ;;  %4062 = vrot.lane.b32.xlu0 %v4066_v13, %s4451_s23 }
  0x3c   :  { %4077 = vrot.lane.b32.xlu1 %v4076_v14, %s4453_s27  ;;  %4072 = vrot.lane.b32.xlu0 %v4066_v13, %s4452_s24 }
  0x40   :  { %4087 = vrot.lane.b32.xlu1 %v4021_v6, %s4455_s29  ;;  %4082 = vrot.lane.b32.xlu0 %v4021_v6, %s4454_s28 }
  0x44   :  { %4092 = vrot.lane.b32.xlu1 %v4021_v6, %s4457_s0  ;;  %198 = vrot.lane.b32.xlu0 %v101_v9, %s4453_s27 }
  0x48   :  { %4097 = vrot.lane.b32.xlu1 %v4021_v6, %s4458_s30  ;;  %292 = vrot.lane.b32.xlu0 %v107_v12, %s4454_s28 }
  0x4c   :  { %341 = vrot.lane.b32.xlu1 %v107_v12, %s4457_s0  ;;  %372 = vrot.lane.b32.xlu0 %v107_v12, %s4455_s29 }
  0x50   :  { %421 = vrot.lane.b32.xlu0 %v107_v12, %s4458_s30 }
  0x8a   :  { %v4562_v21 = vpop.permute.xlu1 %4017  ;;  %v4564_v22 = vpop.permute.xlu0 %4007 }
  0x8b   :  { %v4020_v23 = vunpack.i.h.bf16 %v4562_v21  ;;  %v4019_v24 = vunpack.i.l.bf16 %v4562_v21  ;;  %v4010_v25 = vunpack.i.h.bf16 %v4564_v22  ;;  %v4009_v26 = vunpack.i.l.bf16 %v4564_v22 }
  0x8d   :  { %v131_v27 = vsel %vm126_vm0, %v4019_v24, %v4020_v23  ;;  %v162_v28 = vsel %vm157_vm1, %v4009_v26, %v4010_v25 }
  0x8e   :  { %v134_v29 = vpack.c.bf16 %v131_v27, %v131_v27  ;;  %v165_v30 = vpack.c.bf16 %v162_v28, %v162_v28  ;;  %v4579_v31 = vpop.permute.xlu1 %4022  ;;  %v4581_v32 = vpop.permute.xlu0 %4012 }
  0x8f   :  { %v4025_v33 = vunpack.i.h.bf16 %v4579_v31  ;;  %v4024_v34 = vunpack.i.l.bf16 %v4579_v31  ;;  %v4015_v35 = vunpack.i.h.bf16 %v4581_v32  ;;  %v4014_v36 = vunpack.i.l.bf16 %v4581_v32 }
  0x90   :  { %140 = vst [vmem:[#allocation2 + $0x8] sm:$0x3] %v134_v29  ;;  %v177_v37 = vrot.slane %v165_v30, 4 }
  0x91   :  { %v127_v38 = vsel %vm126_vm0, %v4025_v33, %v4024_v34  ;;  %v132_v39 = vsel %vm126_vm0, %v4024_v34, %v4019_v24  ;;  %v158_v40 = vsel %vm157_vm1, %v4015_v35, %v4014_v36  ;;  %v163_v41 = vsel %vm157_vm1, %v4014_v36, %v4009_v26 }
  0x92   :  { %189 = vst [vmem:[#allocation2 + $0x8] sm:$0x30] %v177_v37  ;;  %v133_v42 = vpack.c.bf16 %v132_v39, %v132_v39  ;;  %v138_v43 = vpack.c.bf16 %v127_v38, %v127_v38  ;;  %v164_v44 = vpack.c.bf16 %v163_v41, %v163_v41  ;;  %v169_v45 = vpack.c.bf16 %v158_v40, %v158_v40  ;;  %v4600_v46 = vpop.permute.xlu1 %4032  ;;  %v4602_v47 = vpop.permute.xlu0 %4027 }
  0x93   :  { %v4035_v48 = vunpack.i.h.bf16 %v4600_v46  ;;  %v4034_v49 = vunpack.i.l.bf16 %v4600_v46  ;;  %v4030_v50 = vunpack.i.h.bf16 %v4602_v47  ;;  %v4029_v51 = vunpack.i.l.bf16 %v4602_v47 }
  0x94   :  { %139 = vst [vmem:[#allocation2] sm:$0x3] %v133_v42  ;;  %144 = vst [vmem:[#allocation2 + $0x28] sm:$0x3] %v138_v43  ;;  %v176_v52 = vrot.slane %v164_v44, 4  ;;  %v181_v53 = vrot.slane %v169_v45, 4 }
  0x95   :  { %v238_v54 = vsel %vm237_vm2, %v4035_v48, %v4034_v49  ;;  %v242_v55 = vsel %vm237_vm2, %v4029_v51, %v4030_v50  ;;  %v243_v56 = vsel %vm237_vm2, %v4034_v49, %v4029_v51 }
  0x96   :  { %188 = vst [vmem:[#allocation2] sm:$0x30] %v176_v52  ;;  %193 = vst [vmem:[#allocation2 + $0x28] sm:$0x30] %v181_v53  ;;  %v249_v57 = vpack.c.bf16 %v238_v54, %v238_v54  ;;  %v244_v58 = vpack.c.bf16 %v243_v56, %v243_v56  ;;  %v245_v59 = vpack.c.bf16 %v242_v55, %v242_v55  ;;  %v4618_v60 = vpop.permute.xlu1 %204  ;;  %v4620_v61 = vpop.permute.xlu0 %4037 }
  0x97   :  { %v4040_v62 = vunpack.i.h.bf16 %v4620_v61  ;;  %v4039_v63 = vunpack.i.l.bf16 %v4620_v61 }
  0x98   :  { %v261_v0 = vrot.slane %v249_v57, 4  ;;  %v256_v1 = vrot.slane %v244_v58, 4  ;;  %v257_v2 = vrot.slane %v245_v59, 4 }
  0x99   :  { %v211_v3 = vsel %vm206_vm3, %v4039_v63, %v4040_v62  ;;  %v212_v4 = vsel %vm206_vm3, %v4618_v60, %v4039_v63  ;;  %v448_v5 = vld [vmem:[#allocation2 + $0x8] sm:$0xff] }
  0x9a   :  { %273 = vst [vmem:[#allocation2 + $0x58] sm:$0x30] %v261_v0  ;;  %268 = vst [vmem:[#allocation2 + $0x30] sm:$0x30] %v256_v1  ;;  %v213_v6 = vpack.c.bf16 %v212_v4, %v212_v4  ;;  %v214_v7 = vpack.c.bf16 %v211_v3, %v211_v3  ;;  %v4631_v8 = vpop.permute.xlu1 %286  ;;  %v4634_v9 = vpop.permute.xlu0 %4042  ;;  %481 = vmatprep.subr.bf16.mxu0 %v448_v5 }
  0x9b   :  { %269 = vst [vmem:[#allocation2 + $0x38] sm:$0x30] %v257_v2  ;;  %v4045_v10 = vunpack.i.h.bf16 %v4634_v9  ;;  %v4044_v11 = vunpack.i.l.bf16 %v4634_v9 }
  0x9c   :  { %219 = vst [vmem:[#allocation2 + $0x30] sm:$0x3] %v213_v6  ;;  %220 = vst [vmem:[#allocation2 + $0x38] sm:$0x3] %v214_v7 }
  0x9d   :  { %v302_v12 = vsel %vm298_vm4, %v4044_v11, %v4045_v10  ;;  %v303_v13 = vsel %vm298_vm4, %v4631_v8, %v4044_v11  ;;  %v447_v14 = vld [vmem:[#allocation2] sm:$0xff] }
  0x9e   :  { %v305_v15 = vpack.c.bf16 %v303_v13, %v303_v13  ;;  %v306_v16 = vpack.c.bf16 %v302_v12, %v302_v12  ;;  %v4645_v17 = vpop.permute.xlu1 %366  ;;  %v4648_v18 = vpop.permute.xlu0 %4047  ;;  %482 = vmatpush1.bf16.msra.mxu0 %v447_v14 }
  0x9f   :  { %v4050_v24 = vunpack.i.h.bf16 %v4648_v18  ;;  %v4049_v26 = vunpack.i.l.bf16 %v4648_v18 }
  0xa0   :  { %v317_v27 = vrot.slane %v305_v15, 4  ;;  %v318_v28 = vrot.slane %v306_v16, 4 }
  0xa1   :  { %v382_v29 = vsel %vm378_vm5, %v4049_v26, %v4050_v24  ;;  %v383_v30 = vsel %vm378_vm5, %v4645_v17, %v4049_v26 }
  0xa2   :  { %329 = vst [vmem:[#allocation2 + $0x60] sm:$0x30] %v317_v27  ;;  %330 = vst [vmem:[#allocation2 + $0x68] sm:$0x30] %v318_v28  ;;  %v385_v34 = vpack.c.bf16 %v383_v30, %v383_v30  ;;  %v386_v36 = vpack.c.bf16 %v382_v29, %v382_v29  ;;  %v4659_v37 = vpop.permute.xlu1 %335  ;;  %v4662_v38 = vpop.permute.xlu0 %4052 }
  0xa3   :  { %v4055_v39 = vunpack.i.h.bf16 %v4662_v38  ;;  %v4054_v40 = vunpack.i.l.bf16 %v4662_v38  ;;  %v454_v41 = vld [vmem:[#allocation2 + $0x38] sm:$0xff]  ;;  %v453_v42 = vld [vmem:[#allocation2 + $0x30] sm:$0xff] }
  0xa4   :  { %v397_v43 = vrot.slane %v385_v34, 4  ;;  %v398_v44 = vrot.slane %v386_v36, 4  ;;  %483 = vmatprep.subr.bf16.mxu0 %v454_v41 }
  0xa5   :  { %v351_v45 = vsel %vm347_vm6, %v4054_v40, %v4055_v39  ;;  %v352_v49 = vsel %vm347_vm6, %v4659_v37, %v4054_v40  ;;  %484 = vmatpush1.bf16.msra.mxu0 %v453_v42 }
  0xa6   :  { %409 = vst [vmem:[#allocation2 + $0x90] sm:$0x30] %v397_v43  ;;  %410 = vst [vmem:[#allocation2 + $0x98] sm:$0x30] %v398_v44  ;;  %v354_v51 = vpack.c.bf16 %v352_v49, %v352_v49  ;;  %v355_v52 = vpack.c.bf16 %v351_v45, %v351_v45  ;;  %v4673_v53 = vpop.permute.xlu1 %415  ;;  %v4676_v54 = vpop.permute.xlu0 %4057 }
  0xa7   :  { %v4060_v55 = vunpack.i.h.bf16 %v4676_v54  ;;  %v4059_v56 = vunpack.i.l.bf16 %v4676_v54 }
  0xa8   :  { %360 = vst [vmem:[#allocation2 + $0x90] sm:$0x3] %v354_v51  ;;  %361 = vst [vmem:[#allocation2 + $0x98] sm:$0x3] %v355_v52 }
  0xa9   :  { %v431_v57 = vsel %vm427_vm7, %v4059_v56, %v4060_v55  ;;  %v432_v58 = vsel %vm427_vm7, %v4673_v53, %v4059_v56  ;;  %v460_v59 = vld [vmem:[#allocation2 + $0x68] sm:$0xff]  ;;  %v459_v63 = vld [vmem:[#allocation2 + $0x60] sm:$0xff] }
  0xaa   :  { %v434_v0 = vpack.c.bf16 %v432_v58, %v432_v58  ;;  %v435_v1 = vpack.c.bf16 %v431_v57, %v431_v57  ;;  %v4068_v2 = vpop.permute.xlu1 %4067  ;;  %v4063_v3 = vpop.permute.xlu0 %4062  ;;  %485 = vmatprep.subr.bf16.mxu0 %v460_v59 }
  0xab   :  { %v4070_v4 = vunpack.i.h.bf16 %v4068_v2  ;;  %v4069_v5 = vunpack.i.l.bf16 %v4068_v2  ;;  %v4065_v6 = vunpack.i.h.bf16 %v4063_v3  ;;  %v4064_v7 = vunpack.i.l.bf16 %v4063_v3  ;;  %486 = vmatpush1.bf16.msra.mxu0 %v459_v63  ;;  %v452_v2 = vld [vmem:[#allocation2 + $0x28] sm:$0xff] }
  0xac   :  { %440 = vst [vmem:[#allocation2 + $0xc0] sm:$0x3] %v434_v0  ;;  %441 = vst [vmem:[#allocation2 + $0xc8] sm:$0x3] %v435_v1 }
  0xad   :  { %v128_v11 = vsel %vm126_vm0, %v4069_v5, %v4025_v33  ;;  %v129_v12 = vsel %vm126_vm0, %v4070_v4, %v4069_v5  ;;  %v130_v13 = vsel %vm126_vm0, %v4020_v23, %v4070_v4  ;;  %v159_v14 = vsel %vm157_vm1, %v4064_v7, %v4015_v35 }
  0xae   :  { %v135_v15 = vpack.c.bf16 %v130_v13, %v130_v13  ;;  %v136_v16 = vpack.c.bf16 %v129_v12, %v129_v12  ;;  %v137_v26 = vpack.c.bf16 %v128_v11, %v128_v11  ;;  %v160_v31 = vsel %vm157_vm1, %v4065_v6, %v4064_v7  ;;  %v4703_v33 = vpop.permute.xlu1 %4077  ;;  %v4073_v27 = vpop.permute.xlu0 %4072 }
  0xaf   :  { %v161_v21 = vsel %vm157_vm1, %v4010_v25, %v4065_v6  ;;  %v167_v23 = vpack.c.bf16 %v160_v31, %v160_v31  ;;  %v168_v28 = vpack.c.bf16 %v159_v14, %v159_v14  ;;  %v4080_v32 = vunpack.i.h.bf16 %v4703_v33  ;;  %v466_v29 = vld [vmem:[#allocation2 + $0x98] sm:$0xff]  ;;  %v465_v35 = vld [vmem:[#allocation2 + $0x90] sm:$0xff] }
  0xb0   :  { %141 = vst [vmem:[#allocation2 + $0x10] sm:$0x3] %v135_v15  ;;  %142 = vst [vmem:[#allocation2 + $0x18] sm:$0x3] %v136_v16  ;;  %v166_v30 = vpack.c.bf16 %v161_v21, %v161_v21  ;;  %v4079_v34 = vunpack.i.l.bf16 %v4703_v33  ;;  %v4075_v36 = vunpack.i.h.bf16 %v4073_v27  ;;  %v4074_v40 = vunpack.i.l.bf16 %v4073_v27  ;;  %487 = vmatprep.subr.bf16.mxu0 %v466_v29 }
  0xb1   :  { %143 = vst [vmem:[#allocation2 + $0x20] sm:$0x3] %v137_v26  ;;  %v179_v41 = vrot.slane %v167_v23, 4  ;;  %v180_v22 = vrot.slane %v168_v28, 4  ;;  %488 = vmatpush1.bf16.msra.mxu0 %v465_v35  ;;  %v4767_v23 = vld [vmem:[#allocation2 + $0xa0] sm:$0xff] }
  0xb2   :  { %v178_v42 = vrot.slane %v166_v30, 4  ;;  %v207_v25 = vsel %vm206_vm3, %v4079_v34, %v4618_v60  ;;  %v208_v43 = vsel %vm206_vm3, %v4080_v32, %v4079_v34  ;;  %v239_v44 = vsel %vm237_vm2, %v4074_v40, %v4035_v48  ;;  %v4722_v45 = vpop.permute.xlu1 %4087  ;;  %v4724_v49 = vpop.permute.xlu0 %4082 }
  0xb3   :  { %191 = vst [vmem:[#allocation2 + $0x18] sm:$0x30] %v179_v41  ;;  %192 = vst [vmem:[#allocation2 + $0x20] sm:$0x30] %v180_v22  ;;  %v217_v51 = vpack.c.bf16 %v208_v43, %v208_v43  ;;  %v218_v52 = vpack.c.bf16 %v207_v25, %v207_v25  ;;  %v240_v60 = vsel %vm237_vm2, %v4075_v36, %v4074_v40  ;;  %v472_v46 = vld [vmem:[#allocation2 + $0xc8] sm:$0xff]  ;;  %v471_v57 = vld [vmem:[#allocation2 + $0xc0] sm:$0xff]  ;;  %v4090_v63 = vunpack.i.h.bf16 %v4722_v45 }
  0xb4   :  { %v241_v56 = vsel %vm237_vm2, %v4030_v50, %v4075_v36  ;;  %190 = vst [vmem:[#allocation2 + $0x10] sm:$0x30] %v178_v42  ;;  %v247_v58 = vpack.c.bf16 %v240_v60, %v240_v60  ;;  %v248_v59 = vpack.c.bf16 %v239_v44, %v239_v44  ;;  %489 = vmatprep.subr.bf16.mxu0 %v472_v46  ;;  %v4089_v0 = vunpack.i.l.bf16 %v4722_v45  ;;  %v4739_v50 = vld [vmem:[%s5219_s1] sm:$0xf] }
  0xb5   :  { %v246_v48 = vpack.c.bf16 %v241_v56, %v241_v56  ;;  %223 = vst [vmem:[#allocation2 + $0x50] sm:$0x3] %v217_v51  ;;  %224 = vst [vmem:[#allocation2 + $0x58] sm:$0x3] %v218_v52  ;;  %v4085_v1 = vunpack.i.h.bf16 %v4724_v49  ;;  %v4084_v47 = vunpack.i.l.bf16 %v4724_v49  ;;  %490 = vmatpush1.bf16.msra.mxu0 %v471_v57 }
  0xb6   :  { %v259_v4 = vrot.slane %v247_v58, 4  ;;  %v260_v5 = vrot.slane %v248_v59, 4  ;;  %v4741_v6 = vpop.permute.xlu1 %4092  ;;  %v199_v7 = vpop.permute.xlu0 %198  ;;  %563 = vmatprep.subr.bf16.mxu0 %v452_v2  ;;  %v379_v11 = vsel %vm378_vm5, %v4090_v63, %v4089_v0  ;;  %v384_v12 = vsel %vm378_vm5, %v4089_v0, %v4645_v17 }
  0xb7   :  { %v258_v3 = vrot.slane %v246_v48, 4  ;;  %v299_v13 = vsel %vm298_vm4, %v4085_v1, %v4084_v47  ;;  %v304_v14 = vsel %vm298_vm4, %v4084_v47, %v4631_v8  ;;  %v389_v15 = vpack.c.bf16 %v379_v11, %v379_v11 }
  0xb8   :  { %271 = vst [vmem:[#allocation2 + $0x48] sm:$0x30] %v259_v4  ;;  %272 = vst [vmem:[#allocation2 + $0x50] sm:$0x30] %v260_v5  ;;  %v390_v16 = vpack.c.bf16 %v384_v12, %v384_v12  ;;  %v309_v26 = vpack.c.bf16 %v299_v13, %v299_v13  ;;  %v310_v31 = vpack.c.bf16 %v304_v14, %v304_v14  ;;  %3527 = vmatmul.mubr.msk.bf16.vlgmr.msra.gmra.mrb[0].mxu0 %vm477_vm8, %v4739_v50 }
  0xb9   :  { %270 = vst [vmem:[#allocation2 + $0x40] sm:$0x30] %v258_v3  ;;  %v4095_v27 = vunpack.i.h.bf16 %v4741_v6  ;;  %v4094_v17 = vunpack.i.l.bf16 %v4741_v6  ;;  %v209_v21 = vsel %vm206_vm3, %v199_v7, %v4080_v32  ;;  %v210_v8 = vsel %vm206_vm3, %v4040_v62, %v199_v7  ;;  %595 = vmatprep.mubr.bf16.mxu0 %v4767_v23 }
  0xba   :  { %v401_v28 = vrot.slane %v389_v15, 4  ;;  %v402_v29 = vrot.slane %v390_v16, 4  ;;  %v321_v35 = vrot.slane %v309_v26, 4  ;;  %v322_v30 = vrot.slane %v310_v31, 4  ;;  %v4098_v34 = vpop.permute.xlu1 %4097  ;;  %v293_v36 = vpop.permute.xlu0 %292  ;;  %v450_v40 = vld [vmem:[#allocation2 + $0x18] sm:$0xff]  ;;  %v451_v33 = vld [vmem:[#allocation2 + $0x20] sm:$0xff] }
  0xbb   :  { %v348_v32 = vsel %vm347_vm6, %v4095_v27, %v4094_v17  ;;  %v353_v61 = vsel %vm347_vm6, %v4094_v17, %v4659_v37  ;;  %v215_v62 = vpack.c.bf16 %v210_v8, %v210_v8  ;;  %v216_v41 = vpack.c.bf16 %v209_v21, %v209_v21  ;;  %522 = vmatprep.subr.bf16.mxu1 %v450_v40  ;;  %v449_v22 = vld [vmem:[#allocation2 + $0x10] sm:$0xff] }
  0xbc   :  { %413 = vst [vmem:[#allocation2 + $0xb0] sm:$0x30] %v401_v28  ;;  %414 = vst [vmem:[#allocation2 + $0xb8] sm:$0x30] %v402_v29  ;;  %v358_v42 = vpack.c.bf16 %v348_v32, %v348_v32  ;;  %v359_v25 = vpack.c.bf16 %v353_v61, %v353_v61  ;;  %v4100_v43 = vunpack.i.h.bf16 %v4098_v34  ;;  %v4099_v44 = vunpack.i.l.bf16 %v4098_v34  ;;  %564 = vmatpush1.bf16.msra.mxu0 %v451_v33  ;;  %v458_v49 = vld [vmem:[#allocation2 + $0x58] sm:$0xff] }
  0xbd   :  { %333 = vst [vmem:[#allocation2 + $0x80] sm:$0x30] %v321_v35  ;;  %334 = vst [vmem:[#allocation2 + $0x88] sm:$0x30] %v322_v30  ;;  %523 = vmatpush1.bf16.msra.mxu1 %v449_v22  ;;  %v300_v37 = vsel %vm298_vm4, %v293_v36, %v4085_v1  ;;  %v301_v51 = vsel %vm298_vm4, %v4045_v10, %v293_v36  ;;  %565 = vmatprep.subr.bf16.mxu0 %v458_v49  ;;  %v4813_v28 = vshrl.u32 %v85_v19, 7 }
  0xbe   :  { %221 = vst [vmem:[#allocation2 + $0x40] sm:$0x3] %v215_v62  ;;  %222 = vst [vmem:[#allocation2 + $0x48] sm:$0x3] %v216_v41  ;;  %v428_v52 = vsel %vm427_vm7, %v4100_v43, %v4099_v44  ;;  %v433_v60 = vsel %vm427_vm7, %v4099_v44, %v4673_v53  ;;  %v307_v56 = vpack.c.bf16 %v301_v51, %v301_v51  ;;  %v342_v57 = vpop.permute.xlu1 %341  ;;  %v373_v48 = vpop.permute.xlu0 %372  ;;  %v83_v35 = vld [vmem:[%s5223_s5] sm:$0x7] }
  0xbf   :  { %364 = vst [vmem:[#allocation2 + $0xb0] sm:$0x3] %v358_v42  ;;  %365 = vst [vmem:[#allocation2 + $0xb8] sm:$0x3] %v359_v25  ;;  %v308_v46 = vpack.c.bf16 %v300_v37, %v300_v37  ;;  %v438_v58 = vpack.c.bf16 %v428_v52, %v428_v52  ;;  %v439_v59 = vpack.c.bf16 %v433_v60, %v433_v60  ;;  %v457_v0 = vld [vmem:[#allocation2 + $0x50] sm:$0xff]  ;;  %v87_v29 = vsub.s32 0, %v4813_v28 }
  0xc0   :  { %v349_v9 = vsel %vm347_vm6, %v342_v57, %v4095_v27  ;;  %v350_v10 = vsel %vm347_vm6, %v4055_v39, %v342_v57  ;;  %v319_v1 = vrot.slane %v307_v56, 4  ;;  %566 = vmatpush1.bf16.msra.mxu0 %v457_v0  ;;  %v380_v53 = vsel %vm378_vm5, %v373_v48, %v4090_v63 }
  0xc1   :  { %v320_v47 = vrot.slane %v308_v46, 4  ;;  %v356_v2 = vpack.c.bf16 %v350_v10, %v350_v10  ;;  %v357_v3 = vpack.c.bf16 %v349_v9, %v349_v9  ;;  %444 = vst [vmem:[#allocation2 + $0xe0] sm:$0x3] %v438_v58  ;;  %445 = vst [vmem:[#allocation2 + $0xe8] sm:$0x3] %v439_v59  ;;  %v381_v38 = vsel %vm378_vm5, %v4050_v24, %v373_v48 }
  0xc2   :  { %331 = vst [vmem:[#allocation2 + $0x70] sm:$0x30] %v319_v1  ;;  %v387_v39 = vpack.c.bf16 %v381_v38, %v381_v38  ;;  %v388_v4 = vpack.c.bf16 %v380_v53, %v380_v53  ;;  %v422_v5 = vpop.permute.xlu0 %421  ;;  %v91_v30 = vsub.s32 1, %v4813_v28  ;;  %v88_v34 = vrot.slane %v83_v35, %v87_v29 }
  0xc3   :  { %332 = vst [vmem:[#allocation2 + $0x78] sm:$0x30] %v320_v47  ;;  %362 = vst [vmem:[#allocation2 + $0xa0] sm:$0x3] %v356_v2  ;;  %v429_v6 = vsel %vm427_vm7, %v422_v5, %v4100_v43  ;;  %v430_v45 = vsel %vm427_vm7, %v4060_v55, %v422_v5  ;;  %v95_v37 = vsub.s32 2, %v4813_v28 }
  0xc4   :  { %363 = vst [vmem:[#allocation2 + $0xa8] sm:$0x3] %v357_v3  ;;  %v464_v63 = vld [vmem:[#allocation2 + $0x88] sm:$0xff]  ;;  %v463_v18 = vld [vmem:[#allocation2 + $0x80] sm:$0xff]  ;;  %v399_v7 = vrot.slane %v387_v39, 4  ;;  %v400_v11 = vrot.slane %v388_v4, 4  ;;  %v436_v24 = vpack.c.bf16 %v430_v45, %v430_v45  ;;  %v437_v12 = vpack.c.bf16 %v429_v6, %v429_v6 }
  0xc5   :  { %v456_v13 = vld [vmem:[#allocation2 + $0x48] sm:$0xff]  ;;  %567 = vmatprep.subr.bf16.mxu0 %v464_v63  ;;  %v455_v14 = vld [vmem:[#allocation2 + $0x40] sm:$0xff]  ;;  %v92_v36 = vrot.slane %v83_v35, %v91_v30  ;;  %v619_v40 = vrot.slane %v88_v34, %v87_v29  ;;  %v96_v51 = vrot.slane %v83_v35, %v95_v37 }
  0xc6   :  { %524 = vmatprep.subr.bf16.mxu1 %v456_v13  ;;  %568 = vmatpush1.bf16.msra.mxu0 %v463_v18  ;;  %v470_v15 = vld [vmem:[#allocation2 + $0xb8] sm:$0xff]  ;;  %411 = vst [vmem:[#allocation2 + $0xa0] sm:$0x30] %v399_v7  ;;  %412 = vst [vmem:[#allocation2 + $0xa8] sm:$0x30] %v400_v11  ;;  %v469_v54 = vld [vmem:[#allocation2 + $0xb0] sm:$0xff] }
  0xc7   :  { %442 = vst [vmem:[#allocation2 + $0xd0] sm:$0x3] %v436_v24  ;;  %443 = vst [vmem:[#allocation2 + $0xd8] sm:$0x3] %v437_v12  ;;  %525 = vmatpush1.bf16.msra.mxu1 %v455_v14  ;;  %569 = vmatprep.subr.bf16.mxu0 %v470_v15  ;;  %v623_v32 = vrot.slane %v92_v36, %v87_v29  ;;  %v627_v60 = vrot.slane %v96_v51, %v87_v29 }
  0xc8   :  { %v476_v55 = vld [vmem:[#allocation2 + $0xe8] sm:$0xff]  ;;  %v475_v31 = vld [vmem:[#allocation2 + $0xe0] sm:$0xff] }
  0xc9   :  { %v461_v26 = vld [vmem:[#allocation2 + $0x70] sm:$0xff] }
  0xca   :  { %570 = vmatpush1.bf16.msra.mxu0 %v469_v54  ;;  %v462_v16 = vld [vmem:[#allocation2 + $0x78] sm:$0xff] }
  0xcb   :  { %526 = vmatprep.subr.bf16.mxu1 %v462_v16  ;;  %571 = vmatprep.subr.bf16.mxu0 %v476_v55 }
  0xcc   :  { %527 = vmatpush1.bf16.msra.mxu1 %v461_v26 }
  0xcd   :  { %v468_v27 = vld [vmem:[#allocation2 + $0xa8] sm:$0xff]  ;;  %v467_v17 = vld [vmem:[#allocation2 + $0xa0] sm:$0xff] }
  0xce   :  { %572 = vmatpush1.bf16.msra.mxu0 %v475_v31  ;;  %v474_v21 = vld [vmem:[#allocation2 + $0xd8] sm:$0xff]  ;;  %528 = vmatprep.subr.bf16.mxu1 %v468_v27  ;;  %v473_v8 = vld [vmem:[#allocation2 + $0xd0] sm:$0xff] }
  0xd0   :  { %529 = vmatpush1.bf16.msra.mxu1 %v467_v17 }
  0xd1   :  { %530 = vmatprep.subr.bf16.mxu1 %v474_v21  ;;  %3529 = vmatmul.mubr.msk.bf16.vlgmr.msra.gmra.mrb[4].mxu0 %vm477_vm8, %v4739_v50 }
  0xd2   :  { %1065 = vmatprep.mubr.bf16.mxu0 %v4767_v23 }
  0xd4   :  { %531 = vmatpush1.bf16.msra.mxu1 %v473_v8 }
  0xd7   :  { %3528 = vmatmul.mubr.msk.bf16.vlgmr.msra.gmra.mrb[0].mxu1 %vm477_vm8, %v4739_v50 }
  0xd8   :  { %1024 = vmatprep.mubr.bf16.mxu1 %v4767_v23 }
 0x18b   :  { %v515_v33 = vpop.f32.mrb[0].mxu0 }
 0x18c   :  { %604 = vst [vmem:[%s5224_s6] sm:$0xff] %v515_v33  ;;  %v610_v50 = vmax.f32 %v515_v33, 0.0  ;;  %v517_v61 = vpop.f32.mrb[1].mxu0 }
 0x18d   :  { %605 = vst [vmem:[%s5224_s6 + $0x8] sm:$0xff] %v517_v61  ;;  %v611_v62 = vmax.f32 %v517_v61, 0.0  ;;  %v519_v41 = vpop.f32.mrb[2].mxu0 }
 0x18e   :  { %v628_v22 = vmul.f32 %v619_v40, %v610_v50  ;;  %v520_v42 = vpop.f32.mrb[3].mxu0 }
 0x18f   :  { %v629_v25 = vmul.f32 %v623_v32, %v611_v62 }
 0x190   :  { %v790_v43 = vpack.c.bf16 %v628_v22, %v628_v22  ;;  %802 = vrot.lane.b32.xlu0 %v628_v22, %s4454_s28 }
 0x191   :  { %v791_v44 = vpack.c.bf16 %v629_v25, %v629_v25  ;;  %v4101_v49 = vpack.i.bf16 %v629_v25, %v628_v22 }
 0x192   :  { %796 = vst [vmem:[#allocation2 + $0x60] sm:$0xf] %v790_v43 }
 0x193   :  { %797 = vst [vmem:[#allocation2 + $0x68] sm:$0xf] %v791_v44  ;;  %4102 = vrot.lane.b32.xlu1 %v4101_v49, %s4451_s23 }
 0x194   :  { %880 = vrot.lane.b32.xlu0 %v628_v22, %s4455_s29 }
 0x197   :  { %4107 = vrot.lane.b32.xlu1 %v4101_v49, %s4450_s22 }
 0x19b   :  { %4112 = vrot.lane.b32.xlu1 %v4101_v49, %s4452_s24 }
 0x19f   :  { %4117 = vrot.lane.b32.xlu1 %v4101_v49, %s4453_s27 }
 0x1a4   :  { %v597_v52 = vpop.f32.mrb[4].mxu0 }
 0x1a5   :  { %608 = vst [vmem:[%s5224_s6 + $0x20] sm:$0xff] %v597_v52  ;;  %v614_v56 = vmax.f32 %v597_v52, 0.0  ;;  %v599_v46 = vpop.f32.mrb[5].mxu0 }
 0x1a6   :  { %609 = vst [vmem:[%s5224_s6 + $0x28] sm:$0xff] %v599_v46  ;;  %v615_v57 = vmax.f32 %v599_v46, 0.0  ;;  %v601_v48 = vpop.f32.mrb[6].mxu0 }
 0x1a7   :  { %v632_v58 = vmul.f32 %v623_v32, %v614_v56  ;;  %v602_v59 = vpop.f32.mrb[7].mxu0 }
 0x1a8   :  { %v633_v9 = vmul.f32 %v627_v60, %v615_v57 }
 0x1a9   :  { %v794_v10 = vpack.c.bf16 %v632_v58, %v632_v58 }
 0x1aa   :  { %v795_v0 = vpack.c.bf16 %v633_v9, %v633_v9  ;;  %v556_v1 = vpop.f32.mrb[0].mxu1 }
 0x1ab   :  { %800 = vst [vmem:[#allocation2 + $0x80] sm:$0xf] %v794_v10  ;;  %606 = vst [vmem:[%s5224_s6 + $0x10] sm:$0xff] %v556_v1  ;;  %v612_v47 = vmax.f32 %v556_v1, 0.0  ;;  %v558_v2 = vpop.f32.mrb[1].mxu1 }
 0x1ac   :  { %801 = vst [vmem:[#allocation2 + $0x88] sm:$0xf] %v795_v0  ;;  %607 = vst [vmem:[%s5224_s6 + $0x18] sm:$0xff] %v558_v2  ;;  %v613_v3 = vmax.f32 %v558_v2, 0.0  ;;  %v560_v53 = vpop.f32.mrb[2].mxu1 }
 0x1ad   :  { %v630_v38 = vmul.f32 %v627_v60, %v612_v47  ;;  %v561_v39 = vpop.f32.mrb[3].mxu1 }
 0x1ae   :  { %v631_v4 = vmul.f32 %v619_v40, %v613_v3 }
 0x1af   :  { %v792_v5 = vpack.c.bf16 %v630_v38, %v630_v38  ;;  %v4121_v6 = vpack.i.bf16 %v630_v38, %v629_v25  ;;  %v4136_v45 = vpack.i.bf16 %v630_v38, %v633_v9 }
 0x1b0   :  { %v793_v63 = vpack.c.bf16 %v631_v4, %v631_v4  ;;  %v4166_v18 = vpack.i.bf16 %v632_v58, %v631_v4  ;;  %v4171_v7 = vpack.i.bf16 %v631_v4, %v630_v38 }
 0x1b1   :  { %798 = vst [vmem:[#allocation2 + $0x70] sm:$0xf] %v792_v5  ;;  %4122 = vrot.lane.b32.xlu1 %v4121_v6, %s4454_s28  ;;  %4137 = vrot.lane.b32.xlu0 %v4136_v45, %s4451_s23 }
 0x1b2   :  { %799 = vst [vmem:[#allocation2 + $0x78] sm:$0xf] %v793_v63 }
 0x1b5   :  { %4127 = vrot.lane.b32.xlu1 %v4121_v6, %s4455_s29  ;;  %4142 = vrot.lane.b32.xlu0 %v4136_v45, %s4450_s22 }
 0x1b9   :  { %4132 = vrot.lane.b32.xlu1 %v4121_v6, %s4457_s0  ;;  %4147 = vrot.lane.b32.xlu0 %v4136_v45, %s4452_s24 }
 0x1bd   :  { %4152 = vrot.lane.b32.xlu1 %v4121_v6, %s4458_s30  ;;  %722 = vrot.lane.b32.xlu0 %v633_v9, %s4453_s27 }
 0x1c1   :  { %928 = vrot.lane.b32.xlu1 %v628_v22, %s4458_s30  ;;  %850 = vrot.lane.b32.xlu0 %v628_v22, %s4457_s0 }
 0x1c5   :  { %4167 = vrot.lane.b32.xlu1 %v4166_v18, %s4452_s24  ;;  %4157 = vrot.lane.b32.xlu0 %v4166_v18, %s4451_s23 }
 0x1c9   :  { %720 = vrot.lane.b32.xlu1 %v632_v58, %s4453_s27  ;;  %4162 = vrot.lane.b32.xlu0 %v4166_v18, %s4450_s22 }
 0x1cd   :  { %812 = vrot.lane.b32.xlu1 %v633_v9, %s4454_s28  ;;  %4172 = vrot.lane.b32.xlu0 %v4171_v7, %s4453_s27 }
 0x1d1   :  { %890 = vrot.lane.b32.xlu1 %v633_v9, %s4455_s29  ;;  %4177 = vrot.lane.b32.xlu0 %v4166_v18, %s4454_s28 }
 0x1d5   :  { %860 = vrot.lane.b32.xlu1 %v633_v9, %s4457_s0  ;;  %4182 = vrot.lane.b32.xlu0 %v4166_v18, %s4455_s29 }
 0x1d9   :  { %938 = vrot.lane.b32.xlu1 %v633_v9, %s4458_s30  ;;  %4187 = vrot.lane.b32.xlu0 %v4166_v18, %s4457_s0 }
 0x1dd   :  { %4192 = vrot.lane.b32.xlu0 %v4166_v18, %s4458_s30 }
 0x202   :  { %v4892_v50 = vpop.permute.xlu0 %802 }
 0x205   :  { %v4103_v11 = vpop.permute.xlu1 %4102 }
 0x206   :  { %v4105_v24 = vunpack.i.h.bf16 %v4103_v11  ;;  %v4104_v12 = vunpack.i.l.bf16 %v4103_v11  ;;  %v4894_v61 = vpop.permute.xlu0 %880 }
 0x208   :  { %v680_v13 = vsel %vm157_vm1, %v4104_v12, %v4105_v24 }
 0x209   :  { %v683_v14 = vpack.c.bf16 %v680_v13, %v680_v13  ;;  %v4108_v15 = vpop.permute.xlu1 %4107 }
 0x20a   :  { %v4110_v54 = vunpack.i.h.bf16 %v4108_v15  ;;  %v4109_v55 = vunpack.i.l.bf16 %v4108_v15 }
 0x20b   :  { %v695_v16 = vrot.slane %v683_v14, 4 }
 0x20c   :  { %v650_v26 = vsel %vm126_vm0, %v4109_v55, %v4110_v54 }
 0x20d   :  { %707 = vst [vmem:[#allocation2 + $0x8] sm:$0xf0] %v695_v16  ;;  %v653_v31 = vpack.c.bf16 %v650_v26, %v650_v26  ;;  %v4872_v27 = vpop.permute.xlu1 %4112 }
 0x20e   :  { %v4115_v17 = vunpack.i.h.bf16 %v4872_v27  ;;  %v4114_v21 = vunpack.i.l.bf16 %v4872_v27 }
 0x20f   :  { %659 = vst [vmem:[#allocation2 + $0x8] sm:$0xf] %v653_v31 }
 0x210   :  { %v758_v8 = vsel %vm237_vm2, %v4114_v21, %v4115_v17 }
 0x211   :  { %v761_v29 = vpack.c.bf16 %v758_v8, %v758_v8  ;;  %v4882_v35 = vpop.permute.xlu1 %4117 }
 0x212   :  { %v4120_v30 = vunpack.i.h.bf16 %v4882_v35  ;;  %v4119_v34 = vunpack.i.l.bf16 %v4882_v35 }
 0x213   :  { %v773_v36 = vrot.slane %v761_v29, 4 }
 0x214   :  { %v728_v40 = vsel %vm206_vm3, %v4119_v34, %v4120_v30 }
 0x215   :  { %785 = vst [vmem:[#allocation2 + $0x38] sm:$0xf0] %v773_v36  ;;  %v731_v33 = vpack.c.bf16 %v728_v40, %v728_v40 }
 0x216   :  { %v960_v32 = vld [vmem:[#allocation2 + $0x8] sm:$0xff] }
 0x217   :  { %737 = vst [vmem:[#allocation2 + $0x38] sm:$0xf] %v731_v33  ;;  %992 = vmatprep.subr.bf16.mxu1 %v960_v32 }
 0x223   :  { %v4896_v62 = vpop.permute.xlu1 %4122  ;;  %v4898_v41 = vpop.permute.xlu0 %4137 }
 0x224   :  { %v4125_v22 = vunpack.i.h.bf16 %v4896_v62  ;;  %v4124_v42 = vunpack.i.l.bf16 %v4896_v62  ;;  %v4140_v25 = vunpack.i.h.bf16 %v4898_v41  ;;  %v4139_v43 = vunpack.i.l.bf16 %v4898_v41 }
 0x226   :  { %v817_v44 = vsel %vm298_vm4, %v4124_v42, %v4125_v22  ;;  %v818_v49 = vsel %vm298_vm4, %v4892_v50, %v4124_v42  ;;  %v679_v37 = vsel %vm157_vm1, %v4105_v24, %v4140_v25  ;;  %v681_v51 = vsel %vm157_vm1, %v4139_v43, %v4104_v12 }
 0x227   :  { %v820_v52 = vpack.c.bf16 %v818_v49, %v818_v49  ;;  %v821_v60 = vpack.c.bf16 %v817_v44, %v817_v44  ;;  %v684_v56 = vpack.c.bf16 %v679_v37, %v679_v37  ;;  %v682_v46 = vpack.c.bf16 %v681_v51, %v681_v51  ;;  %v4919_v57 = vpop.permute.xlu1 %4127  ;;  %v4921_v48 = vpop.permute.xlu0 %4142 }
 0x228   :  { %v4130_v58 = vunpack.i.h.bf16 %v4919_v57  ;;  %v4129_v59 = vunpack.i.l.bf16 %v4919_v57  ;;  %v4145_v9 = vunpack.i.h.bf16 %v4921_v48  ;;  %v4144_v10 = vunpack.i.l.bf16 %v4921_v48 }
 0x229   :  { %v832_v0 = vrot.slane %v820_v52, 4  ;;  %v833_v1 = vrot.slane %v821_v60, 4  ;;  %v696_v47 = vrot.slane %v684_v56, 4  ;;  %v694_v2 = vrot.slane %v682_v46, 4  ;;  %v966_v56 = vld [vmem:[#allocation2 + $0x38] sm:$0xff] }
 0x22a   :  { %v895_v3 = vsel %vm378_vm5, %v4129_v59, %v4130_v58  ;;  %v896_v53 = vsel %vm378_vm5, %v4894_v61, %v4129_v59  ;;  %v649_v38 = vsel %vm126_vm0, %v4110_v54, %v4145_v9  ;;  %v651_v39 = vsel %vm126_vm0, %v4144_v10, %v4109_v55 }
 0x22b   :  { %844 = vst [vmem:[#allocation2 + $0x60] sm:$0xf0] %v832_v0  ;;  %845 = vst [vmem:[#allocation2 + $0x68] sm:$0xf0] %v833_v1  ;;  %v898_v4 = vpack.c.bf16 %v896_v53, %v896_v53  ;;  %v899_v5 = vpack.c.bf16 %v895_v3, %v895_v3  ;;  %v654_v6 = vpack.c.bf16 %v649_v38, %v649_v38  ;;  %v4942_v63 = vpop.permute.xlu1 %4132  ;;  %v4148_v18 = vpop.permute.xlu0 %4147 }
 0x22c   :  { %708 = vst [vmem:[#allocation2 + $0x10] sm:$0xf0] %v696_v47  ;;  %706 = vst [vmem:[#allocation2] sm:$0xf0] %v694_v2  ;;  %v652_v45 = vpack.c.bf16 %v651_v39, %v651_v39  ;;  %v4135_v7 = vunpack.i.h.bf16 %v4942_v63  ;;  %v4134_v11 = vunpack.i.l.bf16 %v4942_v63  ;;  %v4150_v24 = vunpack.i.h.bf16 %v4148_v18 }
 0x22d   :  { %v4149_v12 = vunpack.i.l.bf16 %v4148_v18  ;;  %v910_v13 = vrot.slane %v898_v4, 4  ;;  %v911_v14 = vrot.slane %v899_v5, 4  ;;  %660 = vst [vmem:[#allocation2 + $0x10] sm:$0xf] %v654_v6 }
 0x22e   :  { %658 = vst [vmem:[#allocation2] sm:$0xf] %v652_v45  ;;  %v865_v15 = vsel %vm347_vm6, %v4134_v11, %v4135_v7  ;;  %v757_v54 = vsel %vm237_vm2, %v4115_v17, %v4150_v24 }
 0x22f   :  { %v759_v55 = vsel %vm237_vm2, %v4149_v12, %v4114_v21  ;;  %922 = vst [vmem:[#allocation2 + $0x90] sm:$0xf0] %v910_v13  ;;  %923 = vst [vmem:[#allocation2 + $0x98] sm:$0xf0] %v911_v14  ;;  %v869_v16 = vpack.c.bf16 %v865_v15, %v865_v15  ;;  %v762_v26 = vpack.c.bf16 %v757_v54, %v757_v54  ;;  %v4958_v8 = vpop.permute.xlu1 %4152  ;;  %v723_v29 = vpop.permute.xlu0 %722 }
 0x230   :  { %v760_v31 = vpack.c.bf16 %v759_v55, %v759_v55  ;;  %v4155_v36 = vunpack.i.h.bf16 %v4958_v8  ;;  %v4154_v40 = vunpack.i.l.bf16 %v4958_v8  ;;  %v729_v27 = vsel %vm206_vm3, %v723_v29, %v4119_v34 }
 0x231   :  { %875 = vst [vmem:[#allocation2 + $0x98] sm:$0xf] %v869_v16  ;;  %v774_v17 = vrot.slane %v762_v26, 4  ;;  %v730_v33 = vpack.c.bf16 %v729_v27, %v729_v27 }
 0x232   :  { %v772_v21 = vrot.slane %v760_v31, 4  ;;  %v943_v32 = vsel %vm427_vm7, %v4154_v40, %v4155_v36  ;;  %v972_v13 = vld [vmem:[#allocation2 + $0x68] sm:$0xff] }
 0x233   :  { %786 = vst [vmem:[#allocation2 + $0x40] sm:$0xf0] %v774_v17  ;;  %v947_v42 = vpack.c.bf16 %v943_v32, %v943_v32  ;;  %736 = vst [vmem:[#allocation2 + $0x30] sm:$0xf] %v730_v33  ;;  %v4970_v44 = vpop.permute.xlu1 %928  ;;  %v4972_v49 = vpop.permute.xlu0 %850 }
 0x234   :  { %784 = vst [vmem:[#allocation2 + $0x30] sm:$0xf0] %v772_v21  ;;  %v944_v34 = vsel %vm427_vm7, %v4970_v44, %v4154_v40  ;;  %v866_v37 = vsel %vm347_vm6, %v4972_v49, %v4134_v11  ;;  %v971_v21 = vld [vmem:[#allocation2 + $0x60] sm:$0xff]  ;;  %v961_v57 = vld [vmem:[#allocation2 + $0x10] sm:$0xff] }
 0x235   :  { %v959_v51 = vld [vmem:[#allocation2] sm:$0xff]  ;;  %953 = vst [vmem:[#allocation2 + $0xc8] sm:$0xf] %v947_v42  ;;  %v946_v52 = vpack.c.bf16 %v944_v34, %v944_v34  ;;  %v868_v60 = vpack.c.bf16 %v866_v37, %v866_v37 }
 0x236   :  { %993 = vmatpush1.bf16.msra.mxu1 %v959_v51 }
 0x237   :  { %994 = vmatprep.subr.bf16.mxu1 %v966_v56  ;;  %952 = vst [vmem:[#allocation2 + $0xc0] sm:$0xf] %v946_v52  ;;  %874 = vst [vmem:[#allocation2 + $0x90] sm:$0xf] %v868_v60  ;;  %v4168_v46 = vpop.permute.xlu1 %4167  ;;  %v4158_v59 = vpop.permute.xlu0 %4157 }
 0x238   :  { %v4170_v0 = vunpack.i.h.bf16 %v4168_v46  ;;  %v4169_v1 = vunpack.i.l.bf16 %v4168_v46  ;;  %v4160_v47 = vunpack.i.h.bf16 %v4158_v59  ;;  %v4159_v2 = vunpack.i.l.bf16 %v4158_v59  ;;  %v978_v42 = vld [vmem:[#allocation2 + $0x98] sm:$0xff] }
 0x23a   :  { %v754_v3 = vsel %vm237_vm2, %v4170_v0, %v4149_v12  ;;  %v755_v53 = vsel %vm237_vm2, %v4169_v1, %v4170_v0  ;;  %v756_v38 = vsel %vm237_vm2, %v4150_v24, %v4169_v1  ;;  %v676_v39 = vsel %vm157_vm1, %v4160_v47, %v4139_v43 }
 0x23b   :  { %v965_v4 = vld [vmem:[#allocation2 + $0x30] sm:$0xff]  ;;  %v763_v5 = vpack.c.bf16 %v756_v38, %v756_v38  ;;  %v764_v6 = vpack.c.bf16 %v755_v53, %v755_v53  ;;  %v765_v45 = vpack.c.bf16 %v754_v3, %v754_v3  ;;  %v677_v18 = vsel %vm157_vm1, %v4159_v2, %v4160_v47  ;;  %v721_v11 = vpop.permute.xlu1 %720  ;;  %v4163_v12 = vpop.permute.xlu0 %4162 }
 0x23c   :  { %995 = vmatpush1.bf16.msra.mxu1 %v965_v4  ;;  %v678_v24 = vsel %vm157_vm1, %v4140_v25, %v4159_v2  ;;  %v686_v14 = vpack.c.bf16 %v677_v18, %v677_v18  ;;  %v687_v15 = vpack.c.bf16 %v676_v39, %v676_v39  ;;  %v724_v43 = vsel %vm206_vm3, %v721_v11, %v723_v29  ;;  %v984_v38 = vld [vmem:[#allocation2 + $0xc8] sm:$0xff] }
 0x23d   :  { %996 = vmatprep.subr.bf16.mxu1 %v972_v13  ;;  %v775_v54 = vrot.slane %v763_v5, 4  ;;  %v776_v55 = vrot.slane %v764_v6, 4  ;;  %v777_v16 = vrot.slane %v765_v45, 4  ;;  %v685_v26 = vpack.c.bf16 %v678_v24, %v678_v24 }
 0x23e   :  { %v698_v31 = vrot.slane %v686_v14, 4  ;;  %v699_v40 = vrot.slane %v687_v15, 4  ;;  %v735_v27 = vpack.c.bf16 %v724_v43, %v724_v43  ;;  %v4165_v17 = vunpack.i.h.bf16 %v4163_v12  ;;  %v977_v1 = vld [vmem:[#allocation2 + $0x90] sm:$0xff]  ;;  %v5033_v43 = vld [vmem:[%s5220_s2] sm:$0xf] }
 0x23f   :  { %787 = vst [vmem:[#allocation2 + $0x48] sm:$0xf0] %v775_v54  ;;  %788 = vst [vmem:[#allocation2 + $0x50] sm:$0xf0] %v776_v55  ;;  %v697_v41 = vrot.slane %v685_v26, 4  ;;  %v4164_v25 = vunpack.i.l.bf16 %v4163_v12  ;;  %v813_v33 = vpop.permute.xlu1 %812  ;;  %v4173_v32 = vpop.permute.xlu0 %4172 }
 0x240   :  { %789 = vst [vmem:[#allocation2 + $0x58] sm:$0xf0] %v777_v16  ;;  %997 = vmatpush1.bf16.msra.mxu1 %v971_v21  ;;  %710 = vst [vmem:[#allocation2 + $0x20] sm:$0xf0] %v698_v31  ;;  %v646_v29 = vsel %vm126_vm0, %v4165_v17, %v4144_v10  ;;  %v819_v34 = vsel %vm298_vm4, %v813_v33, %v4892_v50  ;;  %v4175_v37 = vunpack.i.h.bf16 %v4173_v32  ;;  %v4174_v51 = vunpack.i.l.bf16 %v4173_v32 }
 0x241   :  { %711 = vst [vmem:[#allocation2 + $0x28] sm:$0xf0] %v699_v40  ;;  %741 = vst [vmem:[#allocation2 + $0x58] sm:$0xf] %v735_v27  ;;  %998 = vmatprep.subr.bf16.mxu1 %v978_v42  ;;  %v647_v52 = vsel %vm126_vm0, %v4164_v25, %v4165_v17  ;;  %v648_v60 = vsel %vm126_vm0, %v4145_v9, %v4164_v25  ;;  %v657_v56 = vpack.c.bf16 %v646_v29, %v646_v29 }
 0x242   :  { %709 = vst [vmem:[#allocation2 + $0x18] sm:$0xf0] %v697_v41  ;;  %v825_v46 = vpack.c.bf16 %v819_v34, %v819_v34  ;;  %v655_v59 = vpack.c.bf16 %v648_v60, %v648_v60  ;;  %v656_v10 = vpack.c.bf16 %v647_v52, %v647_v52  ;;  %v725_v0 = vsel %vm206_vm3, %v4175_v37, %v721_v11 }
 0x243   :  { %v726_v50 = vsel %vm206_vm3, %v4174_v51, %v4175_v37  ;;  %663 = vst [vmem:[#allocation2 + $0x28] sm:$0xf] %v657_v56  ;;  %v734_v2 = vpack.c.bf16 %v725_v0, %v725_v0  ;;  %v727_v48 = vsel %vm206_vm3, %v4120_v30, %v4174_v51  ;;  %v891_v3 = vpop.permute.xlu1 %890  ;;  %v4178_v53 = vpop.permute.xlu0 %4177 }
 0x244   :  { %v837_v47 = vrot.slane %v825_v46, 4  ;;  %v733_v9 = vpack.c.bf16 %v726_v50, %v726_v50  ;;  %999 = vmatpush1.bf16.msra.mxu1 %v977_v1  ;;  %661 = vst [vmem:[#allocation2 + $0x18] sm:$0xf] %v655_v59  ;;  %662 = vst [vmem:[#allocation2 + $0x20] sm:$0xf] %v656_v10  ;;  %v732_v39 = vpack.c.bf16 %v727_v48, %v727_v48  ;;  %v4180_v5 = vunpack.i.h.bf16 %v4178_v53 }
 0x245   :  { %v897_v4 = vsel %vm378_vm5, %v891_v3, %v4894_v61  ;;  %v4179_v6 = vunpack.i.l.bf16 %v4178_v53  ;;  %1000 = vmatprep.subr.bf16.mxu1 %v984_v38  ;;  %740 = vst [vmem:[#allocation2 + $0x50] sm:$0xf] %v734_v2  ;;  %v983_v61 = vld [vmem:[#allocation2 + $0xc0] sm:$0xff] }
 0x246   :  { %849 = vst [vmem:[#allocation2 + $0x88] sm:$0xf0] %v837_v47  ;;  %739 = vst [vmem:[#allocation2 + $0x48] sm:$0xf] %v733_v9  ;;  %v903_v35 = vpack.c.bf16 %v897_v4, %v897_v4  ;;  %v814_v30 = vsel %vm298_vm4, %v4180_v5, %v813_v33 }
 0x247   :  { %738 = vst [vmem:[#allocation2 + $0x40] sm:$0xf] %v732_v39  ;;  %v815_v45 = vsel %vm298_vm4, %v4179_v6, %v4180_v5  ;;  %v816_v18 = vsel %vm298_vm4, %v4125_v22, %v4179_v6  ;;  %v824_v12 = vpack.c.bf16 %v814_v30, %v814_v30  ;;  %v861_v14 = vpop.permute.xlu1 %860  ;;  %v4183_v15 = vpop.permute.xlu0 %4182 }
 0x248   :  { %v915_v11 = vrot.slane %v903_v35, 4  ;;  %v822_v13 = vpack.c.bf16 %v816_v18, %v816_v18  ;;  %v823_v24 = vpack.c.bf16 %v815_v45, %v815_v45  ;;  %1001 = vmatpush1.bf16.msra.mxu1 %v983_v61  ;;  %v867_v62 = vsel %vm347_vm6, %v861_v14, %v4972_v49  ;;  %v970_v51 = vld [vmem:[#allocation2 + $0x58] sm:$0xff] }
 0x249   :  { %v4185_v54 = vunpack.i.h.bf16 %v4183_v15  ;;  %v4184_v55 = vunpack.i.l.bf16 %v4183_v15  ;;  %v836_v22 = vrot.slane %v824_v12, 4  ;;  %v873_v31 = vpack.c.bf16 %v867_v62, %v867_v62  ;;  %v4202_v15 = vld [vmem:[#allocation4 + $0x80] sm:$0xff]   ;;  %v4203_v62 = vld [vmem:[#allocation4 + $0x48] sm:$0xff]  }
 0x24a   :  { %927 = vst [vmem:[#allocation2 + $0xb8] sm:$0xf0] %v915_v11  ;;  %v834_v16 = vrot.slane %v822_v13, 4  ;;  %v835_v26 = vrot.slane %v823_v24, 4  ;;  %v964_v21 = vld [vmem:[#allocation2 + $0x28] sm:$0xff]  ;;  %v4199_v13 = vld [vmem:[#allocation4 + $0x40] sm:$0xff]  }
 0x24b   :  { %v892_v40 = vsel %vm378_vm5, %v4185_v54, %v891_v3  ;;  %v893_v27 = vsel %vm378_vm5, %v4184_v55, %v4185_v54  ;;  %v894_v17 = vsel %vm378_vm5, %v4130_v58, %v4184_v55  ;;  %3530 = vmatmul.mubr.msk.bf16.vlgmr.msra.gmra.mrb[4].mxu1 %vm477_vm8, %v5033_v43  ;;  %848 = vst [vmem:[#allocation2 + $0x80] sm:$0xf0] %v836_v22  ;;  %879 = vst [vmem:[#allocation2 + $0xb8] sm:$0xf] %v873_v31  ;;  %v962_v33 = vld [vmem:[#allocation2 + $0x18] sm:$0xff]  ;;  %v939_v32 = vpop.permute.xlu1 %938  ;;  %v4188_v42 = vpop.permute.xlu0 %4187  ;;  %v963_v29 = vld [vmem:[#allocation2 + $0x20] sm:$0xff] }
 0x24c   :  { %846 = vst [vmem:[#allocation2 + $0x70] sm:$0xf0] %v834_v16  ;;  %847 = vst [vmem:[#allocation2 + $0x78] sm:$0xf0] %v835_v26  ;;  %v902_v49 = vpack.c.bf16 %v892_v40, %v892_v40  ;;  %v900_v41 = vpack.c.bf16 %v894_v17, %v894_v17  ;;  %v901_v25 = vpack.c.bf16 %v893_v27, %v893_v27  ;;  %1074 = vmatprep.subr.bf16.mxu1 %v964_v21  ;;  %v969_v48 = vld [vmem:[#allocation2 + $0x50] sm:$0xff]  ;;  %v4200_v24 = vld [vmem:[#allocation4] sm:$0xff]  }
 0x24d   :  { %1106 = vmatprep.mubr.bf16.mxu1 %v4767_v23  ;;  %1033 = vmatprep.subr.bf16.mxu0 %v962_v33  ;;  %v945_v58 = vsel %vm427_vm7, %v939_v32, %v4970_v44  ;;  %v4190_v34 = vunpack.i.h.bf16 %v4188_v42  ;;  %v4189_v37 = vunpack.i.l.bf16 %v4188_v42  ;;  %v968_v52 = vld [vmem:[#allocation2 + $0x48] sm:$0xff]  ;;  %v4207_v16 = vld [vmem:[#allocation4 + $0x50] sm:$0xff]   ;;  %v4211_v40 = vld [vmem:[#allocation4 + $0x58] sm:$0xff]  }
 0x24e   :  { %1075 = vmatpush1.bf16.msra.mxu1 %v963_v29  ;;  %v914_v60 = vrot.slane %v902_v49, 4  ;;  %v912_v56 = vrot.slane %v900_v41, 4  ;;  %v913_v46 = vrot.slane %v901_v25, 4  ;;  %1034 = vmatpush1.bf16.msra.mxu0 %v961_v57  ;;  %v951_v59 = vpack.c.bf16 %v945_v58, %v945_v58  ;;  %v967_v0 = vld [vmem:[#allocation2 + $0x40] sm:$0xff]  ;;  %v976_v53 = vld [vmem:[#allocation2 + $0x88] sm:$0xff]  ;;  %v4208_v26 = vld [vmem:[#allocation4 + $0x10] sm:$0xff]  }
 0x24f   :  { %1076 = vmatprep.subr.bf16.mxu1 %v970_v51  ;;  %v862_v23 = vsel %vm347_vm6, %v4190_v34, %v861_v14  ;;  %v863_v10 = vsel %vm347_vm6, %v4189_v37, %v4190_v34  ;;  %v864_v44 = vsel %vm347_vm6, %v4135_v7, %v4189_v37  ;;  %1035 = vmatprep.subr.bf16.mxu0 %v968_v52  ;;  %v4193_v2 = vpop.permute.xlu0 %4192  ;;  %v4201_v14 = vld [vmem:[#allocation4 + $0xc0] sm:$0xff]   ;;  %v4204_v54 = vld [vmem:[#allocation4 + $0x8] sm:$0xff]   ;;  %v4210_v31 = vld [vmem:[#allocation4 + $0x90] sm:$0xff]  }
 0x250   :  { %926 = vst [vmem:[#allocation2 + $0xb0] sm:$0xf0] %v914_v60  ;;  %924 = vst [vmem:[#allocation2 + $0xa0] sm:$0xf0] %v912_v56  ;;  %v872_v50 = vpack.c.bf16 %v862_v23, %v862_v23  ;;  %v870_v1 = vpack.c.bf16 %v864_v44, %v864_v44  ;;  %v871_v47 = vpack.c.bf16 %v863_v10, %v863_v10  ;;  %v4195_v9 = vunpack.i.h.bf16 %v4193_v2  ;;  %v4205_v55 = vld [vmem:[#allocation4 + $0xc8] sm:$0xff]   ;;  %v4212_v27 = vld [vmem:[#allocation4 + $0x18] sm:$0xff]  }
 0x251   :  { %925 = vst [vmem:[#allocation2 + $0xa8] sm:$0xf0] %v913_v46  ;;  %957 = vst [vmem:[#allocation2 + $0xe8] sm:$0xf] %v951_v59  ;;  %v4194_v3 = vunpack.i.l.bf16 %v4193_v2  ;;  %v4206_v22 = vld [vmem:[#allocation4 + $0x88] sm:$0xff]   ;;  %v4213_v17 = vld [vmem:[#allocation4 + $0xd8] sm:$0xff]  }
 0x252   :  { %1077 = vmatpush1.bf16.msra.mxu1 %v969_v48  ;;  %878 = vst [vmem:[#allocation2 + $0xb0] sm:$0xf] %v872_v50  ;;  %876 = vst [vmem:[#allocation2 + $0xa0] sm:$0xf] %v870_v1  ;;  %1036 = vmatpush1.bf16.msra.mxu0 %v967_v0  ;;  %v940_v63 = vsel %vm427_vm7, %v4195_v9, %v939_v32  ;;  %v975_v4 = vld [vmem:[#allocation2 + $0x80] sm:$0xff]  ;;  %v982_v45 = vld [vmem:[#allocation2 + $0xb8] sm:$0xff] }
 0x253   :  { %877 = vst [vmem:[#allocation2 + $0xa8] sm:$0xf] %v871_v47  ;;  %1078 = vmatprep.subr.bf16.mxu1 %v976_v53  ;;  %v941_v7 = vsel %vm427_vm7, %v4194_v3, %v4195_v9  ;;  %v942_v38 = vsel %vm427_vm7, %v4155_v36, %v4194_v3  ;;  %v974_v39 = vld [vmem:[#allocation2 + $0x78] sm:$0xff]  ;;  %v973_v5 = vld [vmem:[#allocation2 + $0x70] sm:$0xff]  ;;  %v950_v6 = vpack.c.bf16 %v940_v63, %v940_v63  ;;  %v4215_v49 = vld [vmem:[#allocation4 + $0x60] sm:$0xff]  }
 0x254   :  { %v948_v35 = vpack.c.bf16 %v942_v38, %v942_v38  ;;  %v949_v30 = vpack.c.bf16 %v941_v7, %v941_v7  ;;  %1037 = vmatprep.subr.bf16.mxu0 %v974_v39  ;;  %v4214_v21 = vld [vmem:[#allocation4 + $0x98] sm:$0xff]   ;;  %v4216_v41 = vld [vmem:[#allocation4 + $0x20] sm:$0xff]   ;;  %v4219_v32 = vld [vmem:[#allocation4 + $0x68] sm:$0xff]   ;;  %v4459_v9 = vmov 1966171168  }
 0x255   :  { %956 = vst [vmem:[#allocation2 + $0xe0] sm:$0xf] %v950_v6  ;;  %v4217_v25 = vld [vmem:[#allocation4 + $0xe0] sm:$0xff]   ;;  %v4220_v42 = vld [vmem:[#allocation4 + $0x28] sm:$0xff]   ;;  %v4223_v57 = vld [vmem:[#allocation4 + $0x70] sm:$0xff]   ;;  %v1132_v3 = vunpack.c.l.s4 %v4459_v9 }
 0x256   :  { %1079 = vmatpush1.bf16.msra.mxu1 %v975_v4  ;;  %954 = vst [vmem:[#allocation2 + $0xd0] sm:$0xf] %v948_v35  ;;  %955 = vst [vmem:[#allocation2 + $0xd8] sm:$0xf] %v949_v30  ;;  %1038 = vmatpush1.bf16.msra.mxu0 %v973_v5  ;;  %v4218_v33 = vld [vmem:[#allocation4 + $0xa0] sm:$0xff]   ;;  %v4221_v29 = vld [vmem:[#allocation4 + $0xe8] sm:$0xff]  }
 0x257   :  { %1080 = vmatprep.subr.bf16.mxu1 %v982_v45  ;;  %v4222_v58 = vld [vmem:[#allocation4 + $0xa8] sm:$0xff]   ;;  %v4225_v34 = vld [vmem:[#allocation4 + $0xf0] sm:$0xff]   ;;  %v4227_v51 = vld [vmem:[#allocation4 + $0x78] sm:$0xff]   ;;  %v1133_v53 = vunpack.c.0.s8 %v1132_v3 }
 0x258   :  { %v988_v20 = vld [vmem:[#allocation2 + $0xe8] sm:$0xff]  ;;  %v4224_v37 = vld [vmem:[#allocation4 + $0x30] sm:$0xff]   ;;  %v4229_v60 = vld [vmem:[#allocation4 + $0xf8] sm:$0xff]  }
 0x259   :  { %v981_v61 = vld [vmem:[#allocation2 + $0xb0] sm:$0xff]  ;;  %v979_v8 = vld [vmem:[#allocation2 + $0xa0] sm:$0xff]  ;;  %v4228_v56 = vld [vmem:[#allocation4 + $0x38] sm:$0xff]   ;;  %v1136_v63 = vsub.s32 %v1133_v53, %v4813_v28 }
 0x25a   :  { %v980_v18 = vld [vmem:[#allocation2 + $0xa8] sm:$0xff]  ;;  %1081 = vmatpush1.bf16.msra.mxu1 %v981_v61  ;;  %v4226_v52 = vld [vmem:[#allocation4 + $0xb0] sm:$0xff]   ;;  %v4230_v46 = vld [vmem:[#allocation4 + $0xb8] sm:$0xff]  }
 0x25b   :  { %1039 = vmatprep.subr.bf16.mxu0 %v980_v18  ;;  %1082 = vmatprep.subr.bf16.mxu1 %v988_v20  ;;  %v4231_v59 = vld [vmem:[#allocation4 + $0x140] sm:$0xff]  }
 0x25c   :  { %1040 = vmatpush1.bf16.msra.mxu0 %v979_v8  ;;  %v987_v11 = vld [vmem:[#allocation2 + $0xe0] sm:$0xff] }
 0x25d   :  { %v986_v36 = vld [vmem:[#allocation2 + $0xd8] sm:$0xff]  ;;  %v985_v12 = vld [vmem:[#allocation2 + $0xd0] sm:$0xff]  ;;  %v4234_v23 = vld [vmem:[#allocation4 + $0x1c0] sm:$0xff]  }
 0x25e   :  { %1041 = vmatprep.subr.bf16.mxu0 %v986_v36  ;;  %1083 = vmatpush1.bf16.msra.mxu1 %v987_v11 }
 0x25f   :  { %3748 = vmatprep.subr.bf16.mxu1 %v4201_v14 }
 0x260   :  { %1042 = vmatpush1.bf16.msra.mxu0 %v985_v12 }
 0x261   :  { %3532 = vmatmul.mubr.msk.bf16.vlgmr.msra.gmra.mrb[8].mxu1 %vm477_vm8, %v5033_v43  ;;  %3726 = vmatprep.subr.bf16.mxu0 %v4199_v13  ;;  %v4460_v13 = vmov 1983009808  }
 0x262   :  { %3749 = vmatpush3.bf16.msra.mxu1 %v4202_v15 }
 0x263   :  { %3531 = vmatmul.mubr.msk.bf16.vlgmr.msra.gmra.mrb[8].mxu0 %vm477_vm8, %v5033_v43  ;;  %3750 = vmatprep.subr.bf16.mxu1 %v4205_v55  ;;  %v4209_v43 = vld [vmem:[#allocation4 + $0xd0] sm:$0xff]  }
 0x264   :  { %3727 = vmatpush3.bf16.msra.mxu0 %v4200_v24  ;;  %v1332_v24 = vunpack.c.l.s4 %v4460_v13  ;;  %v4245_v13 = vld [vmem:[#allocation4 + $0x158] sm:$0xff]  }
 0x265   :  { %3728 = vmatprep.subr.bf16.mxu0 %v4203_v62 }
 0x266   :  { %3751 = vmatpush3.bf16.msra.mxu1 %v4206_v22 }
 0x267   :  { %3752 = vmatprep.subr.bf16.mxu1 %v4209_v43 }
 0x268   :  { %3729 = vmatpush3.bf16.msra.mxu0 %v4204_v54 }
 0x269   :  { %3730 = vmatprep.subr.bf16.mxu0 %v4207_v16 }
 0x26a   :  { %3753 = vmatpush3.bf16.msra.mxu1 %v4210_v31 }
 0x26b   :  { %3754 = vmatprep.subr.bf16.mxu1 %v4213_v17 }
 0x26c   :  { %3731 = vmatpush3.bf16.msra.mxu0 %v4208_v26  ;;  %v4252_v26 = vld [vmem:[#allocation4 + $0x1a0] sm:$0xff]  }
 0x26d   :  { %3732 = vmatprep.subr.bf16.mxu0 %v4211_v40 }
 0x26e   :  { %3755 = vmatpush3.bf16.msra.mxu1 %v4214_v21 }
 0x26f   :  { %3756 = vmatprep.subr.bf16.mxu1 %v4217_v25 }
 0x270   :  { %3733 = vmatpush3.bf16.msra.mxu0 %v4212_v27 }
 0x271   :  { %3734 = vmatprep.subr.bf16.mxu0 %v4215_v49 }
 0x272   :  { %3757 = vmatpush3.bf16.msra.mxu1 %v4218_v33 }
 0x273   :  { %3758 = vmatprep.subr.bf16.mxu1 %v4221_v29 }
 0x274   :  { %3735 = vmatpush3.bf16.msra.mxu0 %v4216_v41 }
 0x275   :  { %3736 = vmatprep.subr.bf16.mxu0 %v4219_v32 }
 0x276   :  { %3759 = vmatpush3.bf16.msra.mxu1 %v4222_v58 }
 0x277   :  { %3760 = vmatprep.subr.bf16.mxu1 %v4225_v34 }
 0x278   :  { %3737 = vmatpush3.bf16.msra.mxu0 %v4220_v42 }
 0x279   :  { %3738 = vmatprep.subr.bf16.mxu0 %v4223_v57 }
 0x27a   :  { %3761 = vmatpush3.bf16.msra.mxu1 %v4226_v52  ;;  %v1333_v52 = vunpack.c.0.s8 %v1332_v24  ;;  %v4244_v24 = vld [vmem:[#allocation4 + $0x190] sm:$0xff]  }
 0x27b   :  { %3762 = vmatprep.subr.bf16.mxu1 %v4229_v60 }
 0x27c   :  { %3739 = vmatpush3.bf16.msra.mxu0 %v4224_v37 }
 0x27d   :  { %3740 = vmatprep.subr.bf16.mxu0 %v4227_v51 }
 0x27e   :  { %3763 = vmatpush3.bf16.msra.mxu1 %v4230_v46 }
 0x27f   :  { %3792 = vmatprep.subr.bf16.mxu1 %v4234_v23 }
 0x280   :  { %3741 = vmatpush3.bf16.msra.mxu0 %v4228_v56 }
 0x281   :  { %3770 = vmatprep.subr.bf16.mxu0 %v4231_v59 }
 0x31e   :  { %v1026_v10 = vpop.f32.mrb[4].mxu1 }
 0x31f   :  { %1115 = vst [vmem:[%s5225_s7] sm:$0xff] %v1026_v10  ;;  %v1121_v44 = vmax.f32 %v1026_v10, 0.0  ;;  %v1028_v0 = vpop.f32.mrb[5].mxu1 }
 0x320   :  { %1116 = vst [vmem:[%s5225_s7 + $0x8] sm:$0xff] %v1028_v0  ;;  %v1122_v50 = vmax.f32 %v1028_v0, 0.0  ;;  %v1030_v1 = vpop.f32.mrb[6].mxu1 }
 0x321   :  { %v1031_v47 = vpop.f32.mrb[7].mxu1 }
 0x322   :  { %v1130_v2 = vcombine.low %v1121_v44, %v1122_v50  ;;  %v1178_v48 = vcombine.high %v1121_v44, %v1122_v50  ;;  %v5129_v44 = vsub.s32 %v1333_v52, %v4813_v28 }
 0x324   :  { %v1137_v8 = vrot.slane %v1130_v2, %v1136_v63  ;;  %v1186_v14 = vrot.slane %v1178_v48, %v1136_v63 }
 0x334   :  { %v1108_v7 = vpop.f32.mrb[8].mxu1 }
 0x335   :  { %1119 = vst [vmem:[%s5225_s7 + $0x20] sm:$0xff] %v1108_v7  ;;  %v1125_v38 = vmax.f32 %v1108_v7, 0.0  ;;  %v1110_v4 = vpop.f32.mrb[9].mxu1 }
 0x336   :  { %v1067_v39 = vpop.f32.mrb[8].mxu0  ;;  %1120 = vst [vmem:[%s5225_s7 + $0x28] sm:$0xff] %v1110_v4  ;;  %v1126_v6 = vmax.f32 %v1110_v4, 0.0  ;;  %v1112_v30 = vpop.f32.mrb[10].mxu1 }
 0x337   :  { %1117 = vst [vmem:[%s5225_s7 + $0x10] sm:$0xff] %v1067_v39  ;;  %v1123_v5 = vmax.f32 %v1067_v39, 0.0  ;;  %v1069_v35 = vpop.f32.mrb[9].mxu0  ;;  %v1113_v61 = vpop.f32.mrb[11].mxu1 }
 0x338   :  { %1118 = vst [vmem:[%s5225_s7 + $0x18] sm:$0xff] %v1069_v35  ;;  %v1124_v45 = vmax.f32 %v1069_v35, 0.0  ;;  %v1071_v18 = vpop.f32.mrb[10].mxu0  ;;  %v1273_v11 = vcombine.high %v1126_v6, %v1126_v6  ;;  %v1241_v43 = vrot.slane %v1126_v6, %v1136_v63  ;;  %v4235_v6 = vld [vmem:[#allocation4 + $0x180] sm:$0xff]   ;;  %v4236_v35 = vld [vmem:[#allocation4 + $0x148] sm:$0xff]  }
 0x339   :  { %v1144_v20 = vrot.slane %v1123_v5, %v1136_v63  ;;  %v1179_v36 = vcombine.high %v1123_v5, %v1123_v5  ;;  %v1072_v12 = vpop.f32.mrb[11].mxu0  ;;  %v4239_v18 = vld [vmem:[#allocation4 + $0x1c8] sm:$0xff]  }
 0x33a   :  { %v1227_v15 = vcombine.low %v1124_v45, %v1125_v38  ;;  %v1272_v62 = vcombine.high %v1124_v45, %v1125_v38  ;;  %v1287_v16 = vrot.slane %v1273_v11, %v1136_v63  ;;  %v4238_v61 = vld [vmem:[#allocation4 + $0x108] sm:$0xff]   ;;  %v4243_v11 = vld [vmem:[#allocation4 + $0x1d0] sm:$0xff]  }
 0x33b   :  { %v1145_v54 = vcombine.low %v1137_v8, %v1144_v20  ;;  %v1159_v55 = vcombine.high %v1137_v8, %v1144_v20  ;;  %v1193_v22 = vrot.slane %v1179_v36, %v1136_v63  ;;  %v4241_v20 = vld [vmem:[#allocation4 + $0x150] sm:$0xff]   ;;  %v4240_v36 = vld [vmem:[#allocation4 + $0x188] sm:$0xff]  }
 0x33c   :  { %v1234_v31 = vrot.slane %v1227_v15, %v1136_v63  ;;  %v1280_v40 = vrot.slane %v1272_v62, %v1136_v63  ;;  %v4242_v12 = vld [vmem:[#allocation4 + $0x110] sm:$0xff]   ;;  %v4246_v15 = vld [vmem:[#allocation4 + $0x118] sm:$0xff]   ;;  %v4249_v62 = vld [vmem:[#allocation4 + $0x160] sm:$0xff]  }
 0x33d   :  { %v1152_v27 = vrot.slane %v1145_v54, %v1136_v63  ;;  %v1166_v17 = vrot.slane %v1159_v55, %v1136_v63  ;;  %v1194_v21 = vcombine.low %v1186_v14, %v1193_v22  ;;  %v1205_v49 = vcombine.high %v1186_v14, %v1193_v22  ;;  %v4247_v14 = vld [vmem:[#allocation4 + $0x1d8] sm:$0xff]   ;;  %v4251_v55 = vld [vmem:[#allocation4 + $0x1e0] sm:$0xff]  }
 0x33e   :  { %v1242_v41 = vcombine.low %v1234_v31, %v1241_v43  ;;  %v1253_v25 = vcombine.high %v1234_v31, %v1241_v43  ;;  %v1288_v33 = vcombine.low %v1280_v40, %v1287_v16  ;;  %v1299_v32 = vcombine.high %v1280_v40, %v1287_v16  ;;  %v4248_v54 = vld [vmem:[#allocation4 + $0x198] sm:$0xff]   ;;  %v4250_v22 = vld [vmem:[#allocation4 + $0x120] sm:$0xff]   ;;  %v4253_v16 = vld [vmem:[#allocation4 + $0x168] sm:$0xff]  }
 0x33f   :  { %1158 = vst.msk [vmem:[#allocation3] ss:$2 sm:$0x7] %vm5092_vm9, %v1152_v27  ;;  %1169 = vst.msk [vmem:[#allocation3 + $0x6] ss:$2 sm:$0x7] %vm5092_vm9, %v1166_v17  ;;  %v1170_v19 = vcombine.high %v1152_v27, %v1152_v27  ;;  %v1174_v42 = vcombine.high %v1166_v17, %v1166_v17  ;;  %v1201_v29 = vrot.slane %v1194_v21, %v1136_v63 }
 0x340   :  { %v1212_v57 = vrot.slane %v1205_v49, %v1136_v63  ;;  %v1249_v58 = vrot.slane %v1242_v41, %v1136_v63  ;;  %v1260_v34 = vrot.slane %v1253_v25, %v1136_v63  ;;  %v1295_v37 = vrot.slane %v1288_v33, %v1136_v63  ;;  %v4255_v43 = vld [vmem:[#allocation4 + $0x1e8] sm:$0xff]   ;;  %v4257_v40 = vld [vmem:[#allocation4 + $0x170] sm:$0xff]   ;;  %v4261_v25 = vld [vmem:[#allocation4 + $0x178] sm:$0xff]  }
 0x341   :  { %v1306_v51 = vrot.slane %v1299_v32, %v1136_v63  ;;  %1173 = vst.msk [vmem:[#allocation3 + $0xc] ss:$2 sm:$0x7] %vm5092_vm9, %v1170_v19  ;;  %1177 = vst.msk [vmem:[#allocation3 + $0x12] ss:$2 sm:$0x7] %vm5092_vm9, %v1174_v42  ;;  %v1216_v60 = vcombine.high %v1201_v29, %v1201_v29 }
 0x342   :  { %1204 = vst.msk [vmem:[#allocation3 + $0x18] ss:$2 sm:$0x7] %vm5092_vm9, %v1201_v29  ;;  %1215 = vst.msk [vmem:[#allocation3 + $0x1e] ss:$2 sm:$0x7] %vm5092_vm9, %v1212_v57  ;;  %v1220_v56 = vcombine.high %v1212_v57, %v1212_v57  ;;  %v1264_v46 = vcombine.high %v1249_v58, %v1249_v58  ;;  %v1268_v59 = vcombine.high %v1260_v34, %v1260_v34 }
 0x343   :  { %1252 = vst.msk [vmem:[#allocation3 + $0x1] ss:$2 sm:$0x7] %vm5092_vm9, %v1249_v58  ;;  %1263 = vst.msk [vmem:[#allocation3 + $0x7] ss:$2 sm:$0x7] %vm5092_vm9, %v1260_v34  ;;  %v1310_v23 = vcombine.high %v1295_v37, %v1295_v37  ;;  %v1314_v10 = vcombine.high %v1306_v51, %v1306_v51 }
 0x344   :  { %1298 = vst.msk [vmem:[#allocation3 + $0x19] ss:$2 sm:$0x7] %vm5092_vm9, %v1295_v37  ;;  %1309 = vst.msk [vmem:[#allocation3 + $0x1f] ss:$2 sm:$0x7] %vm5092_vm9, %v1306_v51 }
 0x345   :  { %1219 = vst.msk [vmem:[#allocation3 + $0x24] ss:$2 sm:$0x7] %vm5092_vm9, %v1216_v60  ;;  %1223 = vst.msk [vmem:[#allocation3 + $0x2a] ss:$2 sm:$0x7] %vm5092_vm9, %v1220_v56 }
 0x346   :  { %1267 = vst.msk [vmem:[#allocation3 + $0xd] ss:$2 sm:$0x7] %vm5092_vm9, %v1264_v46  ;;  %1271 = vst.msk [vmem:[#allocation3 + $0x13] ss:$2 sm:$0x7] %vm5092_vm9, %v1268_v59 }
 0x347   :  { %1313 = vst.msk [vmem:[#allocation3 + $0x25] ss:$2 sm:$0x7] %vm5092_vm9, %v1310_v23  ;;  %1317 = vst.msk [vmem:[#allocation3 + $0x2b] ss:$2 sm:$0x7] %vm5092_vm9, %v1314_v10 }
 0x348   :  { %v4232_v63 = vld [vmem:[#allocation4 + $0x100] sm:$0xff]   ;;  %v4254_v31 = vld [vmem:[#allocation4 + $0x128] sm:$0xff]   ;;  %v4259_v21 = vld [vmem:[#allocation4 + $0x1f0] sm:$0xff]  }
 0x349   :  { %v4256_v17 = vld [vmem:[#allocation4 + $0x1a8] sm:$0xff]   ;;  %v4258_v49 = vld [vmem:[#allocation4 + $0x130] sm:$0xff]   ;;  %v4263_v19 = vld [vmem:[#allocation4 + $0x1f8] sm:$0xff]  }
 0x34a   :  { %v1318_v0 = vld [vmem:[#allocation3] sm:$0xff]  ;;  %v4262_v42 = vld [vmem:[#allocation4 + $0x138] sm:$0xff]   ;;  %v4265_v57 = vld [vmem:[#allocation4 + $0x240] sm:$0xff]  }
 0x34b   :  { %v1337_v50 = vrot.slane %v1318_v0, %v5129_v44  ;;  %v1330_v1 = vcombine.high %v1318_v0, %v1318_v0  ;;  %v4260_v33 = vld [vmem:[#allocation4 + $0x1b0] sm:$0xff]   ;;  %v4264_v58 = vld [vmem:[#allocation4 + $0x1b8] sm:$0xff]   ;;  %v4267_v37 = vld [vmem:[#allocation4 + $0x2c0] sm:$0xff]  }
 0x34c   :  { %v4266_v51 = vld [vmem:[#allocation4 + $0x200] sm:$0xff]   ;;  %v4270_v56 = vld [vmem:[#allocation4 + $0x248] sm:$0xff]  }
 0x34d   :  { %v1319_v47 = vld [vmem:[#allocation3 + $0x8] sm:$0xff]  ;;  %v1345_v2 = vcombine.high %v1337_v50, %v1337_v50  ;;  %v1344_v48 = vrot.slane %v1330_v1, %v5129_v44  ;;  %v1456_v28 = vpack.c.bf16 %v1337_v50, %v1337_v50  ;;  %v1320_v27 = vld [vmem:[#allocation3 + $0x10] sm:$0xff]  ;;  %v4272_v10 = vld [vmem:[#allocation4 + $0x2c8] sm:$0xff]  }
 0x34e   :  { %v5134_v9 = vrot.slane %v1319_v47, %v5129_v44  ;;  %v1347_v3 = vcombine.high %v1319_v47, %v1319_v47  ;;  %v1364_v41 = vcombine.high %v1320_v27, %v1320_v27  ;;  %v5144_v32 = vrot.slane %v1320_v27, %v5129_v44  ;;  %v4268_v59 = vld [vmem:[#allocation4 + $0x280] sm:$0xff]   ;;  %v4271_v50 = vld [vmem:[#allocation4 + $0x208] sm:$0xff]   ;;  %v4274_v1 = vld [vmem:[#allocation4 + $0x250] sm:$0xff]  }
 0x34f   :  { %v1457_v53 = vpack.c.bf16 %v1345_v2, %v1345_v2  ;;  %v1346_v7 = vcombine.high %v1344_v48, %v1344_v48  ;;  %v1458_v30 = vpack.c.bf16 %v1344_v48, %v1344_v48  ;;  %v4273_v47 = vld [vmem:[#allocation4 + $0x288] sm:$0xff]   ;;  %v4276_v2 = vld [vmem:[#allocation4 + $0x2d0] sm:$0xff]  }
 0x350   :  { %v1362_v38 = vcombine.high %v5134_v9, %v5134_v9  ;;  %v5139_v39 = vrot.slane %v1347_v3, %v5129_v44  ;;  %v5147_v29 = vrot.slane %v1364_v41, %v5129_v44  ;;  %v1379_v34 = vcombine.high %v5144_v32, %v5144_v32  ;;  %v4275_v48 = vld [vmem:[#allocation4 + $0x210] sm:$0xff]  }
 0x351   :  { %3055 = vmatprep.mubr.bf16.mxu0 %v1457_v53  ;;  %v1459_v4 = vpack.c.bf16 %v1346_v7, %v1346_v7  ;;  %v1460_v60 = vpack.c.bf16 %v5134_v9, %v5134_v9  ;;  %v4278_v9 = vld [vmem:[#allocation4 + $0x258] sm:$0xff]   ;;  %v4277_v3 = vld [vmem:[#allocation4 + $0x290] sm:$0xff]   ;;  %v4282_v7 = vld [vmem:[#allocation4 + $0x260] sm:$0xff]  }
 0x352   :  { %v1461_v5 = vpack.c.bf16 %v1362_v38, %v1362_v38  ;;  %3056 = vmatmul.mubr.bf16.vlgmr.msra.gmra.mrb[12].mxu0 %v1456_v28  ;;  %v1363_v45 = vcombine.high %v5139_v39, %v5139_v39  ;;  %v1380_v52 = vcombine.high %v5147_v29, %v5147_v29  ;;  %v1465_v46 = vpack.c.bf16 %v1379_v34, %v1379_v34  ;;  %v4280_v53 = vld [vmem:[#allocation4 + $0x2d8] sm:$0xff]   ;;  %v4284_v28 = vld [vmem:[#allocation4 + $0x2e0] sm:$0xff]   ;;  %v4307_v41 = vld [vmem:[#allocation4 + $0x350] sm:$0xff]  }
 0x353   :  { %3771 = vmatpush3.bf16.msra.mxu0 %v4232_v63  ;;  %3095 = vmatprep.mubr.bf16.mxu1 %v1459_v4  ;;  %v1462_v23 = vpack.c.bf16 %v5139_v39, %v5139_v39  ;;  %v4279_v63 = vld [vmem:[#allocation4 + $0x218] sm:$0xff]   ;;  %v4283_v39 = vld [vmem:[#allocation4 + $0x220] sm:$0xff]   ;;  %v4286_v4 = vld [vmem:[#allocation4 + $0x268] sm:$0xff]   ;;  %v1466_v27 = vpack.c.bf16 %v5147_v29, %v5147_v29 }
 0x354   :  { %3135 = vmatprep.mubr.bf16.mxu0 %v1461_v5  ;;  %3096 = vmatmul.mubr.bf16.vlgmr.msra.gmra.mrb[12].mxu1 %v1458_v30  ;;  %v1463_v8 = vpack.c.bf16 %v1363_v45, %v1363_v45  ;;  %v1467_v0 = vpack.c.bf16 %v1380_v52, %v1380_v52  ;;  %v4281_v38 = vld [vmem:[#allocation4 + $0x298] sm:$0xff]   ;;  %v4285_v5 = vld [vmem:[#allocation4 + $0x2a0] sm:$0xff]   ;;  %v4290_v30 = vld [vmem:[#allocation4 + $0x270] sm:$0xff]  }
 0x355   :  { %3793 = vmatpush3.bf16.msra.mxu1 %v4235_v6  ;;  %3772 = vmatprep.subr.bf16.mxu0 %v4236_v35  ;;  %v4288_v6 = vld [vmem:[#allocation4 + $0x2e8] sm:$0xff]   ;;  %v4313_v29 = vld [vmem:[#allocation4 + $0x3d8] sm:$0xff]  }
 0x356   :  { %3175 = vmatprep.mubr.bf16.mxu1 %v1463_v8  ;;  %3794 = vmatprep.subr.bf16.mxu1 %v4239_v18  ;;  %v4287_v35 = vld [vmem:[#allocation4 + $0x228] sm:$0xff]   ;;  %v4291_v8 = vld [vmem:[#allocation4 + $0x230] sm:$0xff]   ;;  %v4314_v34 = vld [vmem:[#allocation4 + $0x398] sm:$0xff]  }
 0x357   :  { %3773 = vmatpush3.bf16.msra.mxu0 %v4238_v61  ;;  %v1321_v45 = vld [vmem:[#allocation3 + $0x18] sm:$0xff]  ;;  %v4292_v61 = vld [vmem:[#allocation4 + $0x2f0] sm:$0xff]  }
 0x358   :  { %3774 = vmatprep.subr.bf16.mxu0 %v4241_v20  ;;  %v4289_v18 = vld [vmem:[#allocation4 + $0x2a8] sm:$0xff]   ;;  %v1381_v20 = vcombine.high %v1321_v45, %v1321_v45 }
 0x359   :  { %3795 = vmatpush3.bf16.msra.mxu1 %v4240_v36  ;;  %v4294_v36 = vld [vmem:[#allocation4 + $0x278] sm:$0xff]   ;;  %v4319_v52 = vld [vmem:[#allocation4 + $0x368] sm:$0xff]  }
 0x35a   :  { %3796 = vmatprep.subr.bf16.mxu1 %v4243_v11  ;;  %v4293_v11 = vld [vmem:[#allocation4 + $0x2b0] sm:$0xff]  }
 0x35b   :  { %3775 = vmatpush3.bf16.msra.mxu0 %v4242_v12  ;;  %v5158_v12 = vrot.slane %v1321_v45, %v5129_v44 }
 0x35c   :  { %3776 = vmatprep.subr.bf16.mxu0 %v4245_v13  ;;  %v4296_v13 = vld [vmem:[#allocation4 + $0x2f8] sm:$0xff]  }
 0x35d   :  { %3797 = vmatpush3.bf16.msra.mxu1 %v4244_v24  ;;  %v4295_v24 = vld [vmem:[#allocation4 + $0x238] sm:$0xff]  }
 0x35e   :  { %3798 = vmatprep.subr.bf16.mxu1 %v4247_v14  ;;  %v5161_v14 = vrot.slane %v1381_v20, %v5129_v44  ;;  %v4340_v20 = vld [vmem:[#allocation4 + $0x450] sm:$0xff]  }
 0x35f   :  { %3777 = vmatpush3.bf16.msra.mxu0 %v4246_v15  ;;  %v4298_v15 = vld [vmem:[#allocation4 + $0x340] sm:$0xff]  }
 0x360   :  { %3778 = vmatprep.subr.bf16.mxu0 %v4249_v62  ;;  %v4297_v62 = vld [vmem:[#allocation4 + $0x2b8] sm:$0xff]   ;;  %v1470_v45 = vpack.c.bf16 %v5161_v14, %v5161_v14 }
 0x361   :  { %3799 = vmatpush3.bf16.msra.mxu1 %v4248_v54  ;;  %v1396_v54 = vcombine.high %v5158_v12, %v5158_v12 }
 0x362   :  { %3800 = vmatprep.subr.bf16.mxu1 %v4251_v55  ;;  %v4300_v55 = vld [vmem:[#allocation4 + $0x3c0] sm:$0xff]  }
 0x363   :  { %3779 = vmatpush3.bf16.msra.mxu0 %v4250_v22  ;;  %v4299_v22 = vld [vmem:[#allocation4 + $0x300] sm:$0xff]  }
 0x364   :  { %3780 = vmatprep.subr.bf16.mxu0 %v4253_v16  ;;  %v1397_v16 = vcombine.high %v5161_v14, %v5161_v14  ;;  %v4346_v14 = vld [vmem:[#allocation4 + $0x4d8] sm:$0xff]  }
 0x365   :  { %3801 = vmatpush3.bf16.msra.mxu1 %v4252_v26  ;;  %v1464_v26 = vpack.c.bf16 %v5144_v32, %v5144_v32  ;;  %v4308_v32 = vld [vmem:[#allocation4 + $0x310] sm:$0xff]  }
 0x366   :  { %3802 = vmatprep.subr.bf16.mxu1 %v4255_v43  ;;  %v4303_v43 = vld [vmem:[#allocation4 + $0x348] sm:$0xff]  }
 0x367   :  { %3781 = vmatpush3.bf16.msra.mxu0 %v4254_v31  ;;  %v1469_v31 = vpack.c.bf16 %v1396_v54, %v1396_v54  ;;  %v4347_v54 = vld [vmem:[#allocation4 + $0x498] sm:$0xff]  }
 0x368   :  { %3782 = vmatprep.subr.bf16.mxu0 %v4257_v40  ;;  %v4301_v40 = vld [vmem:[#allocation4 + $0x380] sm:$0xff]  }
 0x369   :  { %3803 = vmatpush3.bf16.msra.mxu1 %v4256_v17  ;;  %v4305_v17 = vld [vmem:[#allocation4 + $0x3c8] sm:$0xff]  }
 0x36a   :  { %3804 = vmatprep.subr.bf16.mxu1 %v4259_v21  ;;  %v1471_v21 = vpack.c.bf16 %v1397_v16, %v1397_v16  ;;  %v4352_v16 = vld [vmem:[#allocation4 + $0x468] sm:$0xff]  }
 0x36b   :  { %3783 = vmatpush3.bf16.msra.mxu0 %v4258_v49  ;;  %v4304_v49 = vld [vmem:[#allocation4 + $0x308] sm:$0xff]  }
 0x36c   :  { %3784 = vmatprep.subr.bf16.mxu0 %v4261_v25  ;;  %v4306_v25 = vld [vmem:[#allocation4 + $0x388] sm:$0xff]  }
 0x36d   :  { %3805 = vmatpush3.bf16.msra.mxu1 %v4260_v33  ;;  %v4309_v33 = vld [vmem:[#allocation4 + $0x3d0] sm:$0xff]  }
 0x36e   :  { %3806 = vmatprep.subr.bf16.mxu1 %v4263_v19  ;;  %v4311_v19 = vld [vmem:[#allocation4 + $0x358] sm:$0xff]  }
 0x36f   :  { %3785 = vmatpush3.bf16.msra.mxu0 %v4262_v42  ;;  %v4310_v42 = vld [vmem:[#allocation4 + $0x390] sm:$0xff]  }
 0x370   :  { %3814 = vmatprep.subr.bf16.mxu0 %v4265_v57  ;;  %v4312_v57 = vld [vmem:[#allocation4 + $0x318] sm:$0xff]  }
 0x371   :  { %3807 = vmatpush3.bf16.msra.mxu1 %v4264_v58  ;;  %v4315_v58 = vld [vmem:[#allocation4 + $0x360] sm:$0xff]  }
 0x372   :  { %3136 = vmatmul.mubr.bf16.vlgmr.msra.gmra.mrb[16].mxu0 %v1460_v60  ;;  %3836 = vmatprep.subr.bf16.mxu1 %v4267_v37  ;;  %v4317_v37 = vld [vmem:[#allocation4 + $0x3e0] sm:$0xff]  }
 0x373   :  { %3815 = vmatpush3.bf16.msra.mxu0 %v4266_v51  ;;  %3215 = vmatprep.mubr.bf16.mxu0 %v1465_v46  ;;  %v4316_v51 = vld [vmem:[#allocation4 + $0x320] sm:$0xff]   ;;  %v4320_v46 = vld [vmem:[#allocation4 + $0x328] sm:$0xff]  }
 0x374   :  { %3176 = vmatmul.mubr.bf16.vlgmr.msra.gmra.mrb[16].mxu1 %v1462_v23  ;;  %3816 = vmatprep.subr.bf16.mxu0 %v4270_v56  ;;  %v4318_v60 = vld [vmem:[#allocation4 + $0x3a0] sm:$0xff]   ;;  %v4321_v56 = vld [vmem:[#allocation4 + $0x3e8] sm:$0xff]   ;;  %v1322_v23 = vld [vmem:[#allocation3 + $0x20] sm:$0xff] }
 0x375   :  { %3837 = vmatpush3.bf16.msra.mxu1 %v4268_v59  ;;  %3255 = vmatprep.mubr.bf16.mxu1 %v1467_v0  ;;  %v4323_v59 = vld [vmem:[#allocation4 + $0x370] sm:$0xff]  }
 0x376   :  { %3838 = vmatprep.subr.bf16.mxu1 %v4272_v10  ;;  %v4322_v10 = vld [vmem:[#allocation4 + $0x3a8] sm:$0xff]   ;;  %v4325_v0 = vld [vmem:[#allocation4 + $0x3f0] sm:$0xff]  }
 0x377   :  { %3817 = vmatpush3.bf16.msra.mxu0 %v4271_v50  ;;  %v4324_v50 = vld [vmem:[#allocation4 + $0x330] sm:$0xff]  }
 0x378   :  { %3818 = vmatprep.subr.bf16.mxu0 %v4274_v1  ;;  %v1398_v1 = vcombine.high %v1322_v23, %v1322_v23 }
 0x379   :  { %3839 = vmatpush3.bf16.msra.mxu1 %v4273_v47  ;;  %v4327_v47 = vld [vmem:[#allocation4 + $0x378] sm:$0xff]  }
 0x37a   :  { %3840 = vmatprep.subr.bf16.mxu1 %v4276_v2  ;;  %v4326_v2 = vld [vmem:[#allocation4 + $0x3b0] sm:$0xff]  }
 0x37b   :  { %3819 = vmatpush3.bf16.msra.mxu0 %v4275_v48  ;;  %v5172_v48 = vrot.slane %v1322_v23, %v5129_v44  ;;  %v4371_v23 = vld [vmem:[#allocation4 + $0x5c8] sm:$0xff]  }
 0x37c   :  { %3820 = vmatprep.subr.bf16.mxu0 %v4278_v9  ;;  %v4329_v9 = vld [vmem:[#allocation4 + $0x3f8] sm:$0xff]  }
 0x37d   :  { %3841 = vmatpush3.bf16.msra.mxu1 %v4277_v3  ;;  %v4328_v3 = vld [vmem:[#allocation4 + $0x338] sm:$0xff]  }
 0x37e   :  { %3842 = vmatprep.subr.bf16.mxu1 %v4280_v53  ;;  %v5175_v53 = vrot.slane %v1398_v1, %v5129_v44  ;;  %v4372_v1 = vld [vmem:[#allocation4 + $0x588] sm:$0xff]  }
 0x37f   :  { %3821 = vmatpush3.bf16.msra.mxu0 %v4279_v63  ;;  %v4331_v63 = vld [vmem:[#allocation4 + $0x440] sm:$0xff]  }
 0x380   :  { %3822 = vmatprep.subr.bf16.mxu0 %v4282_v7  ;;  %v4330_v7 = vld [vmem:[#allocation4 + $0x3b8] sm:$0xff]  }
 0x381   :  { %3843 = vmatpush3.bf16.msra.mxu1 %v4281_v38  ;;  %v1413_v38 = vcombine.high %v5172_v48, %v5172_v48 }
 0x382   :  { %3844 = vmatprep.subr.bf16.mxu1 %v4284_v28  ;;  %v4333_v28 = vld [vmem:[#allocation4 + $0x4c0] sm:$0xff]  }
 0x383   :  { %3823 = vmatpush3.bf16.msra.mxu0 %v4283_v39  ;;  %v4332_v39 = vld [vmem:[#allocation4 + $0x400] sm:$0xff]  }
 0x384   :  { %3824 = vmatprep.subr.bf16.mxu0 %v4286_v4  ;;  %v1414_v4 = vcombine.high %v5175_v53, %v5175_v53 }
 0x385   :  { %3845 = vmatpush3.bf16.msra.mxu1 %v4285_v5  ;;  %v1468_v5 = vpack.c.bf16 %v5158_v12, %v5158_v12  ;;  %v4341_v12 = vld [vmem:[#allocation4 + $0x410] sm:$0xff]  }
 0x386   :  { %3846 = vmatprep.subr.bf16.mxu1 %v4288_v6  ;;  %v4336_v6 = vld [vmem:[#allocation4 + $0x448] sm:$0xff]  }
 0x387   :  { %3825 = vmatpush3.bf16.msra.mxu0 %v4287_v35  ;;  %v1473_v35 = vpack.c.bf16 %v1413_v38, %v1413_v38  ;;  %v4383_v38 = vld [vmem:[#allocation4 + $0x5e0] sm:$0xff]  }
 0x388   :  { %3826 = vmatprep.subr.bf16.mxu0 %v4290_v30  ;;  %v4334_v30 = vld [vmem:[#allocation4 + $0x480] sm:$0xff]  }
 0x389   :  { %3847 = vmatpush3.bf16.msra.mxu1 %v4289_v18  ;;  %v4338_v18 = vld [vmem:[#allocation4 + $0x4c8] sm:$0xff]  }
 0x38a   :  { %3848 = vmatprep.subr.bf16.mxu1 %v4292_v61  ;;  %v1475_v61 = vpack.c.bf16 %v1414_v4, %v1414_v4  ;;  %v4384_v4 = vld [vmem:[#allocation4 + $0x5a0] sm:$0xff]  }
 0x38b   :  { %3827 = vmatpush3.bf16.msra.mxu0 %v4291_v8  ;;  %v4337_v8 = vld [vmem:[#allocation4 + $0x408] sm:$0xff]  }
 0x38c   :  { %3828 = vmatprep.subr.bf16.mxu0 %v4294_v36  ;;  %v4339_v36 = vld [vmem:[#allocation4 + $0x488] sm:$0xff]  }
 0x38d   :  { %3849 = vmatpush3.bf16.msra.mxu1 %v4293_v11  ;;  %v4342_v11 = vld [vmem:[#allocation4 + $0x4d0] sm:$0xff]  }
 0x38e   :  { %3850 = vmatprep.subr.bf16.mxu1 %v4296_v13  ;;  %v4344_v13 = vld [vmem:[#allocation4 + $0x458] sm:$0xff]  }
 0x38f   :  { %3829 = vmatpush3.bf16.msra.mxu0 %v4295_v24  ;;  %v4343_v24 = vld [vmem:[#allocation4 + $0x490] sm:$0xff]  }
 0x390   :  { %3858 = vmatprep.subr.bf16.mxu0 %v4298_v15  ;;  %v4345_v15 = vld [vmem:[#allocation4 + $0x418] sm:$0xff]  }
 0x391   :  { %3851 = vmatpush3.bf16.msra.mxu1 %v4297_v62  ;;  %v4348_v62 = vld [vmem:[#allocation4 + $0x460] sm:$0xff]  }
 0x392   :  { %3216 = vmatmul.mubr.bf16.vlgmr.msra.gmra.mrb[20].mxu0 %v1464_v26  ;;  %3880 = vmatprep.subr.bf16.mxu1 %v4300_v55  ;;  %v4350_v55 = vld [vmem:[#allocation4 + $0x4e0] sm:$0xff]  }
 0x393   :  { %3859 = vmatpush3.bf16.msra.mxu0 %v4299_v22  ;;  %3295 = vmatprep.mubr.bf16.mxu0 %v1469_v31  ;;  %v4349_v22 = vld [vmem:[#allocation4 + $0x420] sm:$0xff]   ;;  %v4353_v31 = vld [vmem:[#allocation4 + $0x428] sm:$0xff]  }
 0x394   :  { %3256 = vmatmul.mubr.bf16.vlgmr.msra.gmra.mrb[20].mxu1 %v1466_v27  ;;  %3860 = vmatprep.subr.bf16.mxu0 %v4303_v43  ;;  %v4351_v26 = vld [vmem:[#allocation4 + $0x4a0] sm:$0xff]   ;;  %v4354_v43 = vld [vmem:[#allocation4 + $0x4e8] sm:$0xff]   ;;  %v1323_v27 = vld [vmem:[#allocation3 + $0x28] sm:$0xff] }
 0x395   :  { %3881 = vmatpush3.bf16.msra.mxu1 %v4301_v40  ;;  %3335 = vmatprep.mubr.bf16.mxu1 %v1471_v21  ;;  %v4356_v40 = vld [vmem:[#allocation4 + $0x470] sm:$0xff]  }
 0x396   :  { %3882 = vmatprep.subr.bf16.mxu1 %v4305_v17  ;;  %v4355_v17 = vld [vmem:[#allocation4 + $0x4a8] sm:$0xff]   ;;  %v4358_v21 = vld [vmem:[#allocation4 + $0x4f0] sm:$0xff]  }
 0x397   :  { %3861 = vmatpush3.bf16.msra.mxu0 %v4304_v49  ;;  %v4357_v49 = vld [vmem:[#allocation4 + $0x430] sm:$0xff]  }
 0x398   :  { %3862 = vmatprep.subr.bf16.mxu0 %v4307_v41  ;;  %v1415_v41 = vcombine.high %v1323_v27, %v1323_v27 }
 0x399   :  { %3883 = vmatpush3.bf16.msra.mxu1 %v4306_v25  ;;  %v4360_v25 = vld [vmem:[#allocation4 + $0x478] sm:$0xff]  }
 0x39a   :  { %3884 = vmatprep.subr.bf16.mxu1 %v4309_v33  ;;  %v4359_v33 = vld [vmem:[#allocation4 + $0x4b0] sm:$0xff]  }
 0x39b   :  { %3863 = vmatpush3.bf16.msra.mxu0 %v4308_v32  ;;  %v5186_v32 = vrot.slane %v1323_v27, %v5129_v44 }
 0x39c   :  { %3864 = vmatprep.subr.bf16.mxu0 %v4311_v19  ;;  %v4362_v19 = vld [vmem:[#allocation4 + $0x4f8] sm:$0xff]  }
 0x39d   :  { %3885 = vmatpush3.bf16.msra.mxu1 %v4310_v42  ;;  %v4361_v42 = vld [vmem:[#allocation4 + $0x438] sm:$0xff]  }
 0x39e   :  { %3886 = vmatprep.subr.bf16.mxu1 %v4313_v29  ;;  %v5189_v29 = vrot.slane %v1415_v41, %v5129_v44  ;;  %v4369_v44 = vld [vmem:[#allocation4 + $0x548] sm:$0xff]  }
 0x39f   :  { %3865 = vmatpush3.bf16.msra.mxu0 %v4312_v57  ;;  %v4364_v57 = vld [vmem:[#allocation4 + $0x540] sm:$0xff]  }
 0x3a0   :  { %3866 = vmatprep.subr.bf16.mxu0 %v4315_v58  ;;  %v4363_v58 = vld [vmem:[#allocation4 + $0x4b8] sm:$0xff]  }
 0x3a1   :  { %3887 = vmatpush3.bf16.msra.mxu1 %v4314_v34  ;;  %v1430_v34 = vcombine.high %v5186_v32, %v5186_v32 }
 0x3a2   :  { %3888 = vmatprep.subr.bf16.mxu1 %v4317_v37  ;;  %v4366_v37 = vld [vmem:[#allocation4 + $0x5c0] sm:$0xff]  }
 0x3a3   :  { %3867 = vmatpush3.bf16.msra.mxu0 %v4316_v51  ;;  %v4365_v51 = vld [vmem:[#allocation4 + $0x500] sm:$0xff]  }
 0x3a4   :  { %3868 = vmatprep.subr.bf16.mxu0 %v4319_v52  ;;  %v1431_v52 = vcombine.high %v5189_v29, %v5189_v29 }
 0x3a5   :  { %3889 = vmatpush3.bf16.msra.mxu1 %v4318_v60  ;;  %v1472_v60 = vpack.c.bf16 %v5172_v48, %v5172_v48  ;;  %v4377_v48 = vld [vmem:[#allocation4 + $0x558] sm:$0xff]  }
 0x3a6   :  { %3890 = vmatprep.subr.bf16.mxu1 %v4321_v56  ;;  %v1477_v56 = vpack.c.bf16 %v1430_v34, %v1430_v34 }
 0x3a7   :  { %3869 = vmatpush3.bf16.msra.mxu0 %v4320_v46  ;;  %v4367_v46 = vld [vmem:[#allocation4 + $0x580] sm:$0xff]  }
 0x3a8   :  { %3870 = vmatprep.subr.bf16.mxu0 %v4323_v59  ;;  %v1474_v59 = vpack.c.bf16 %v5175_v53, %v5175_v53  ;;  %v4378_v53 = vld [vmem:[#allocation4 + $0x518] sm:$0xff]  }
 0x3a9   :  { %3891 = vmatpush3.bf16.msra.mxu1 %v4322_v10  ;;  %v1479_v10 = vpack.c.bf16 %v1431_v52, %v1431_v52 }
 0x3aa   :  { %3892 = vmatprep.subr.bf16.mxu1 %v4325_v0  ;;  %v4370_v0 = vld [vmem:[#allocation4 + $0x508] sm:$0xff]  }
 0x3ab   :  { %3871 = vmatpush3.bf16.msra.mxu0 %v4324_v50  ;;  %v4373_v50 = vld [vmem:[#allocation4 + $0x550] sm:$0xff]  }
 0x3ac   :  { %3872 = vmatprep.subr.bf16.mxu0 %v4327_v47  ;;  %v4375_v47 = vld [vmem:[#allocation4 + $0x5d0] sm:$0xff]  }
 0x3ad   :  { %3893 = vmatpush3.bf16.msra.mxu1 %v4326_v2  ;;  %v4374_v2 = vld [vmem:[#allocation4 + $0x510] sm:$0xff]  }
 0x3ae   :  { %3894 = vmatprep.subr.bf16.mxu1 %v4329_v9  ;;  %v4376_v9 = vld [vmem:[#allocation4 + $0x590] sm:$0xff]  }
 0x3af   :  { %3873 = vmatpush3.bf16.msra.mxu0 %v4328_v3  ;;  %v4379_v3 = vld [vmem:[#allocation4 + $0x5d8] sm:$0xff]  }
 0x3b0   :  { %3902 = vmatprep.subr.bf16.mxu0 %v4331_v63  ;;  %v4381_v63 = vld [vmem:[#allocation4 + $0x560] sm:$0xff]  }
 0x3b1   :  { %3895 = vmatpush3.bf16.msra.mxu1 %v4330_v7  ;;  %v4380_v7 = vld [vmem:[#allocation4 + $0x598] sm:$0xff]  }
 0x3b2   :  { %3296 = vmatmul.mubr.bf16.vlgmr.msra.gmra.mrb[24].mxu0 %v1468_v5  ;;  %3924 = vmatprep.subr.bf16.mxu1 %v4333_v28  ;;  %v4382_v28 = vld [vmem:[#allocation4 + $0x520] sm:$0xff]   ;;  %v4387_v5 = vld [vmem:[#allocation4 + $0x5e8] sm:$0xff]  }
 0x3b3   :  { %3903 = vmatpush3.bf16.msra.mxu0 %v4332_v39  ;;  %3375 = vmatprep.mubr.bf16.mxu0 %v1473_v35  ;;  %v4385_v39 = vld [vmem:[#allocation4 + $0x568] sm:$0xff]   ;;  %v4389_v35 = vld [vmem:[#allocation4 + $0x570] sm:$0xff]  }
 0x3b4   :  { %3336 = vmatmul.mubr.bf16.vlgmr.msra.gmra.mrb[24].mxu1 %v1470_v45  ;;  %3904 = vmatprep.subr.bf16.mxu0 %v4336_v6  ;;  %v4386_v6 = vld [vmem:[#allocation4 + $0x528] sm:$0xff]   ;;  %v4391_v45 = vld [vmem:[#allocation4 + $0x5f0] sm:$0xff]  }
 0x3b5   :  { %3925 = vmatpush3.bf16.msra.mxu1 %v4334_v30  ;;  %3415 = vmatprep.mubr.bf16.mxu1 %v1475_v61  ;;  %v4388_v30 = vld [vmem:[#allocation4 + $0x5a8] sm:$0xff]   ;;  %v4393_v61 = vld [vmem:[#allocation4 + $0x578] sm:$0xff]  }
 0x3b6   :  { %3926 = vmatprep.subr.bf16.mxu1 %v4338_v18  ;;  %v4390_v18 = vld [vmem:[#allocation4 + $0x530] sm:$0xff]  }
 0x3b7   :  { %3905 = vmatpush3.bf16.msra.mxu0 %v4337_v8  ;;  %v4392_v8 = vld [vmem:[#allocation4 + $0x5b0] sm:$0xff]  }
 0x3b8   :  { %3906 = vmatprep.subr.bf16.mxu0 %v4340_v20  ;;  %v4395_v20 = vld [vmem:[#allocation4 + $0x5f8] sm:$0xff]  }
 0x3b9   :  { %3927 = vmatpush3.bf16.msra.mxu1 %v4339_v36  ;;  %v4394_v36 = vld [vmem:[#allocation4 + $0x538] sm:$0xff]  }
 0x3ba   :  { %3928 = vmatprep.subr.bf16.mxu1 %v4342_v11  ;;  %v4396_v11 = vld [vmem:[#allocation4 + $0x5b8] sm:$0xff]  }
 0x3bb   :  { %3907 = vmatpush3.bf16.msra.mxu0 %v4341_v12  ;;  %v1476_v12 = vpack.c.bf16 %v5186_v32, %v5186_v32 }
 0x3bc   :  { %3908 = vmatprep.subr.bf16.mxu0 %v4344_v13  ;;  %v1478_v13 = vpack.c.bf16 %v5189_v29, %v5189_v29 }
 0x3bd   :  { %3929 = vmatpush3.bf16.msra.mxu1 %v4343_v24 }
 0x3be   :  { %3930 = vmatprep.subr.bf16.mxu1 %v4346_v14  ;;  %v3533_v14 = vld [vmem:[%s5222_s4] ss:$0 sm:$0xff]  ;;  %s4461_s4 = smov [#allocation7]  }
 0x3bf   :  { %3909 = vmatpush3.bf16.msra.mxu0 %v4345_v15  ;;  %s3514_s11 = sshll.u32 %s4461_s4, 4  ;;  %s3515_s11 = int_to_ptr.vmem [resolvable:$true] %s3514_s11 }
 0x3c0   :  { %3910 = vmatprep.subr.bf16.mxu0 %v4348_v62  ;;  %s4420_s12 = scalar_lea.vmem %s3515_s11, 32  ;;  %p4425_p9 = scmp.lt.s32.totalorder %s3515_s11, %s3515_s11 }
 0x3c1   :  { %3931 = vmatpush3.bf16.msra.mxu1 %v4347_v54  ;;  %p4421_p8 = scmp.ne.s32.totalorder %s3515_s11, %s4420_s12  ;;  %p4426_p10 = scmp.lt.s32.totalorder %s4420_s12, %s4420_s12 }
 0x3c2   :  { %3932 = vmatprep.subr.bf16.mxu1 %v4350_v55 }
 0x3c3   :  { %3911 = vmatpush3.bf16.msra.mxu0 %v4349_v22  ;;  %p4427_p11 = por %p4426_p10, %p4425_p9 }
 0x3c4   :  { %3912 = vmatprep.subr.bf16.mxu0 %v4352_v16 }
 0x3c5   :  { %3933 = vmatpush3.bf16.msra.mxu1 %v4351_v26  ;;  %p4428_p12 = pnand %p4427_p11, %p4421_p8 }
 0x3c6   :  { %3934 = vmatprep.subr.bf16.mxu1 %v4354_v43 }
 0x3c7   :  { %3913 = vmatpush3.bf16.msra.mxu0 %v4353_v31 }
 0x3c8   :  { %3914 = vmatprep.subr.bf16.mxu0 %v4356_v40 }
 0x3c9   :  { %3935 = vmatpush3.bf16.msra.mxu1 %v4355_v17 }
 0x3ca   :  { %3936 = vmatprep.subr.bf16.mxu1 %v4358_v21 }
 0x3cb   :  { %3915 = vmatpush3.bf16.msra.mxu0 %v4357_v49 }
 0x3cc   :  { %3916 = vmatprep.subr.bf16.mxu0 %v4360_v25 }
 0x3cd   :  { %3937 = vmatpush3.bf16.msra.mxu1 %v4359_v33 }
 0x3ce   :  { %3938 = vmatprep.subr.bf16.mxu1 %v4362_v19 }
 0x3cf   :  { %3917 = vmatpush3.bf16.msra.mxu0 %v4361_v42 }
 0x3d0   :  { %3946 = vmatprep.subr.bf16.mxu0 %v4364_v57 }
 0x3d1   :  { %3939 = vmatpush3.bf16.msra.mxu1 %v4363_v58 }
 0x3d2   :  { %3376 = vmatmul.mubr.bf16.vlgmr.msra.gmra.mrb[28].mxu0 %v1472_v60  ;;  %3968 = vmatprep.subr.bf16.mxu1 %v4366_v37 }
 0x3d3   :  { %3947 = vmatpush3.bf16.msra.mxu0 %v4365_v51  ;;  %3455 = vmatprep.mubr.bf16.mxu0 %v1477_v56 }
 0x3d4   :  { %3416 = vmatmul.mubr.bf16.vlgmr.msra.gmra.mrb[28].mxu1 %v1474_v59  ;;  %3948 = vmatprep.subr.bf16.mxu0 %v4369_v44 }
 0x3d5   :  { %3969 = vmatpush3.bf16.msra.mxu1 %v4367_v46  ;;  %3495 = vmatprep.mubr.bf16.mxu1 %v1479_v10 }
 0x3d6   :  { %3970 = vmatprep.subr.bf16.mxu1 %v4371_v23 }
 0x3d7   :  { %3949 = vmatpush3.bf16.msra.mxu0 %v4370_v0 }
 0x3d8   :  { %3950 = vmatprep.subr.bf16.mxu0 %v4373_v50 }
 0x3d9   :  { %3971 = vmatpush3.bf16.msra.mxu1 %v4372_v1 }
 0x3da   :  { %3972 = vmatprep.subr.bf16.mxu1 %v4375_v47 }
 0x3db   :  { %3951 = vmatpush3.bf16.msra.mxu0 %v4374_v2 }
 0x3dc   :  { %3952 = vmatprep.subr.bf16.mxu0 %v4377_v48 }
 0x3dd   :  { %3973 = vmatpush3.bf16.msra.mxu1 %v4376_v9 }
 0x3de   :  { %3974 = vmatprep.subr.bf16.mxu1 %v4379_v3 }
 0x3df   :  { %3953 = vmatpush3.bf16.msra.mxu0 %v4378_v53 }
 0x3e0   :  { %3954 = vmatprep.subr.bf16.mxu0 %v4381_v63 }
 0x3e1   :  { %3975 = vmatpush3.bf16.msra.mxu1 %v4380_v7 }
 0x3e2   :  { %3976 = vmatprep.subr.bf16.mxu1 %v4383_v38 }
 0x3e3   :  { %3955 = vmatpush3.bf16.msra.mxu0 %v4382_v28 }
 0x3e4   :  { %3956 = vmatprep.subr.bf16.mxu0 %v4385_v39 }
 0x3e5   :  { %3977 = vmatpush3.bf16.msra.mxu1 %v4384_v4 }
 0x3e6   :  { %3978 = vmatprep.subr.bf16.mxu1 %v4387_v5 }
 0x3e7   :  { %3957 = vmatpush3.bf16.msra.mxu0 %v4386_v6 }
 0x3e8   :  { %3958 = vmatprep.subr.bf16.mxu0 %v4389_v35 }
 0x3e9   :  { %3979 = vmatpush3.bf16.msra.mxu1 %v4388_v30 }
 0x3ea   :  { %3980 = vmatprep.subr.bf16.mxu1 %v4391_v45 }
 0x3eb   :  { %3959 = vmatpush3.bf16.msra.mxu0 %v4390_v18 }
 0x3ec   :  { %3960 = vmatprep.subr.bf16.mxu0 %v4393_v61 }
 0x3ed   :  { %3981 = vmatpush3.bf16.msra.mxu1 %v4392_v8 }
 0x3ee   :  { %3982 = vmatprep.subr.bf16.mxu1 %v4395_v20 }
 0x3ef   :  { %3961 = vmatpush3.bf16.msra.mxu0 %v4394_v36 }
 0x3f1   :  { %3983 = vmatpush3.bf16.msra.mxu1 %v4396_v11 }
 0x3f2   :  { %3456 = vmatmul.mubr.bf16.vlgmr.msra.gmra.mrb[32].mxu0 %v1476_v12 }
 0x3f4   :  { %3496 = vmatmul.mubr.bf16.vlgmr.msra.gmra.mrb[32].mxu1 %v1478_v13 }
 0x425   :  { %v3742_v24 = vpop.f32.mrb[12].mxu0 }
 0x426   :  { %v3743_v15 = vpop.f32.mrb[13].mxu0 }
 0x427   :  { %v3744_v62 = vadd.f32 %v3743_v15, %v3742_v24  ;;  %v3745_v54 = vpop.f32.mrb[14].mxu0  ;;  %v3764_v55 = vpop.f32.mrb[12].mxu1 }
 0x428   :  { %v3746_v22 = vpop.f32.mrb[15].mxu0  ;;  %v3765_v16 = vpop.f32.mrb[13].mxu1 }
 0x429   :  { %v3058_v26 = vadd.f32 %v3744_v62, %v3533_v14  ;;  %v3766_v43 = vadd.f32 %v3765_v16, %v3764_v55  ;;  %v3767_v31 = vpop.f32.mrb[14].mxu1 }
 0x42a   :  { %v3768_v40 = vpop.f32.mrb[15].mxu1 }
 0x42b   :  { %v3098_v27 = vadd.f32 %v3766_v43, %v3058_v26 }
 0x445   :  { %v3786_v17 = vpop.f32.mrb[16].mxu0 }
 0x446   :  { %v3787_v21 = vpop.f32.mrb[17].mxu0 }
 0x447   :  { %v3788_v49 = vadd.f32 %v3787_v21, %v3786_v17  ;;  %v3789_v41 = vpop.f32.mrb[18].mxu0  ;;  %v3808_v25 = vpop.f32.mrb[16].mxu1 }
 0x448   :  { %v3790_v33 = vpop.f32.mrb[19].mxu0  ;;  %v3809_v32 = vpop.f32.mrb[17].mxu1 }
 0x449   :  { %v3138_v19 = vadd.f32 %v3788_v49, %v3098_v27  ;;  %v3810_v42 = vadd.f32 %v3809_v32, %v3808_v25  ;;  %v3811_v29 = vpop.f32.mrb[18].mxu1 }
 0x44a   :  { %v3812_v57 = vpop.f32.mrb[19].mxu1 }
 0x44b   :  { %v3178_v58 = vadd.f32 %v3810_v42, %v3138_v19 }
 0x465   :  { %v3830_v34 = vpop.f32.mrb[20].mxu0 }
 0x466   :  { %v3831_v37 = vpop.f32.mrb[21].mxu0 }
 0x467   :  { %v3832_v51 = vadd.f32 %v3831_v37, %v3830_v34  ;;  %v3833_v52 = vpop.f32.mrb[22].mxu0  ;;  %v3852_v60 = vpop.f32.mrb[20].mxu1 }
 0x468   :  { %v3834_v44 = vpop.f32.mrb[23].mxu0  ;;  %v3853_v56 = vpop.f32.mrb[21].mxu1 }
 0x469   :  { %v3218_v46 = vadd.f32 %v3832_v51, %v3178_v58  ;;  %v3854_v59 = vadd.f32 %v3853_v56, %v3852_v60  ;;  %v3855_v23 = vpop.f32.mrb[22].mxu1 }
 0x46a   :  { %v3856_v10 = vpop.f32.mrb[23].mxu1 }
 0x46b   :  { %v3258_v0 = vadd.f32 %v3854_v59, %v3218_v46 }
 0x485   :  { %v3874_v50 = vpop.f32.mrb[24].mxu0 }
 0x486   :  { %v3875_v1 = vpop.f32.mrb[25].mxu0 }
 0x487   :  { %v3876_v47 = vadd.f32 %v3875_v1, %v3874_v50  ;;  %v3877_v2 = vpop.f32.mrb[26].mxu0  ;;  %v3896_v48 = vpop.f32.mrb[24].mxu1 }
 0x488   :  { %v3878_v9 = vpop.f32.mrb[27].mxu0  ;;  %v3897_v3 = vpop.f32.mrb[25].mxu1 }
 0x489   :  { %v3298_v53 = vadd.f32 %v3876_v47, %v3258_v0  ;;  %v3898_v63 = vadd.f32 %v3897_v3, %v3896_v48  ;;  %v3899_v7 = vpop.f32.mrb[26].mxu1 }
 0x48a   :  { %v3900_v38 = vpop.f32.mrb[27].mxu1 }
 0x48b   :  { %v3338_v28 = vadd.f32 %v3898_v63, %v3298_v53 }
 0x4a5   :  { %v3918_v39 = vpop.f32.mrb[28].mxu0 }
 0x4a6   :  { %v3919_v4 = vpop.f32.mrb[29].mxu0 }
 0x4a7   :  { %v3920_v5 = vadd.f32 %v3919_v4, %v3918_v39  ;;  %v3921_v6 = vpop.f32.mrb[30].mxu0  ;;  %v3940_v35 = vpop.f32.mrb[28].mxu1 }
 0x4a8   :  { %v3922_v30 = vpop.f32.mrb[31].mxu0  ;;  %v3941_v45 = vpop.f32.mrb[29].mxu1 }
 0x4a9   :  { %v3378_v18 = vadd.f32 %v3920_v5, %v3338_v28  ;;  %v3942_v61 = vadd.f32 %v3941_v45, %v3940_v35  ;;  %v3943_v8 = vpop.f32.mrb[30].mxu1 }
 0x4aa   :  { %v3944_v20 = vpop.f32.mrb[31].mxu1 }
 0x4ab   :  { %v3418_v36 = vadd.f32 %v3942_v61, %v3378_v18 }
 0x4c5   :  { %v3962_v11 = vpop.f32.mrb[32].mxu0 }
 0x4c6   :  { %v3963_v12 = vpop.f32.mrb[33].mxu0 }
 0x4c7   :  { %v3964_v13 = vadd.f32 %v3963_v12, %v3962_v11  ;;  %v3965_v24 = vpop.f32.mrb[34].mxu0  ;;  %v3984_v14 = vpop.f32.mrb[32].mxu1 }
 0x4c8   :  { %v3966_v15 = vpop.f32.mrb[35].mxu0  ;;  %v3985_v62 = vpop.f32.mrb[33].mxu1 }
 0x4c9   :  { %v3458_v54 = vadd.f32 %v3964_v13, %v3418_v36  ;;  %v3986_v55 = vadd.f32 %v3985_v62, %v3984_v14  ;;  %v3987_v22 = vpop.f32.mrb[34].mxu1 }
 0x4ca   :  { %v3988_v16 = vpop.f32.mrb[35].mxu1 }
 0x4cb   :  { %v3498_v26 = vadd.f32 %v3986_v55, %v3458_v54 }
 0x4cd   :  { %3503 = vst [vmem:[#allocation7] sm:$0x3] %v3498_v26 }
 0x4ce   :  { %4431 = shalt.err (!%p4428_p12)
}
 0x4cf   :  { %s4432_s15 = scalar_lea.hbm %s5226_s8, 32 }
 0x4d0   :  { %p4433_p13 = scmp.ne.s32.totalorder %s5226_s8, %s4432_s15  ;;  %p4436_p0 = scmp.lt.u32.totalorder %s4432_s15, %s5226_s8 }
 0x4d2   :  { %p4438_p1 = pnand %p4436_p0, %p4433_p13 }
 0x4d4   :  { %4441 = shalt.err (!%p4438_p1)
}
 0x4d5   :  { %3517 = dma.vmem_to_hbm [thread:$0]  %s3515_s11, 32, %s5226_s8, [#allocation6]  }
 0x4d6   :  { %4444 = dma.done.wait [#allocation6], 32  }
 0x4d7   :  { %4445 = vsyncadd [#allocation6], 4294967264 }
 0x4d8   :  { %3525 = vsyncpa [#allocation5], 1 }
 0x4d9   :  { %3526 = vsyncpa [#allocation6], 1 }

</bundles_post_ra>
